<compile_context>
chip_gen: v6e
topology: v6e:2x2x1
jax: 0.10.0
libtpu: 0.0.40
codegen_flags: <defaults>
</compile_context>

<pallas_src>
import functools
import math

import jax
import jax.numpy as jnp
from jax.experimental import pallas as pl
from jax.experimental.pallas import tpu as pltpu


# --------------------------- fused transformer block ------------------------

def _layernorm(x, g, b, eps=1e-5):
    mean = jnp.mean(x, axis=-1, keepdims=True)
    var = jnp.mean(jnp.square(x - mean), axis=-1, keepdims=True)
    return (x - mean) * jax.lax.rsqrt(var + eps) * g + b


def _block_kernel(len_ref, x_ref, wqkv_ref, bqkv_ref, wo_ref, bo_ref,
                  ln1g_ref, ln1b_ref, w1_ref, b1_ref, w2_ref, b2_ref,
                  ln2g_ref, ln2b_ref, o_ref, attn_ref, *, n_heads, causal):
    b = pl.program_id(0)
    length = len_ref[b]                              # scalar from SMEM prefetch

    x = x_ref[0].astype(jnp.float32)                 # (S, D) f32 for residual/LN
    S, D = x.shape
    Dh = D // n_heads
    scale = 1.0 / math.sqrt(Dh)

    # Fused QKV projection (bf16 operands on the MXU, f32 accumulation).
    qkv = jnp.dot(x.astype(jnp.bfloat16), wqkv_ref[...],
                  preferred_element_type=jnp.float32) + bqkv_ref[...]
    q, k, v = qkv[:, :D], qkv[:, D:2 * D], qkv[:, 2 * D:]

    # Additive mask built in-kernel from the prefetched length (no HBM mask).
    # TODO(synk): for long S, switch to flash-style q-tiling (running max/denom)
    # so the (S,S) scores + (S,d_ff) FFN intermediate never co-reside in VMEM.
    key_idx = jax.lax.broadcasted_iota(jnp.int32, (S, S), 1)
    mask = jnp.where(key_idx < length, 0.0, -1e9).astype(jnp.float32)
    if causal:
        q_idx = jax.lax.broadcasted_iota(jnp.int32, (S, S), 0)
        mask = jnp.where(q_idx >= key_idx, mask, -1e9)

    # Per-head attention: bf16 MXU inputs, f32 accumulation, result written
    # straight into the bf16 VMEM scratch slab (no lane-dim concatenate,
    # bounded vreg live ranges).
    for h in range(n_heads):
        qh = q[:, h * Dh:(h + 1) * Dh].astype(jnp.bfloat16)
        kh = k[:, h * Dh:(h + 1) * Dh].astype(jnp.bfloat16)
        vh = v[:, h * Dh:(h + 1) * Dh].astype(jnp.bfloat16)
        s = jax.lax.dot_general(qh, kh, (((1,), (1,)), ((), ())),
                                preferred_element_type=jnp.float32)
        s = s * scale + mask
        s = s - jnp.max(s, axis=-1, keepdims=True)
        p = jnp.exp(s)
        p = p * pl.reciprocal(jnp.sum(p, axis=-1, keepdims=True), approx=True)
        pv = jnp.dot(p.astype(jnp.bfloat16), vh,
                     preferred_element_type=jnp.float32)
        attn_ref[:, h * Dh:(h + 1) * Dh] = pv.astype(attn_ref.dtype)

    attn = jnp.dot(attn_ref[...], wo_ref[...],
                   preferred_element_type=jnp.float32) + bo_ref[...]

    # Post-LN with fused residual adds (matches the reference block semantics).
    h1 = _layernorm(x + attn, ln1g_ref[...], ln1b_ref[...])
    ff = jnp.dot(h1.astype(jnp.bfloat16), w1_ref[...],
                 preferred_element_type=jnp.float32) + b1_ref[...]
    ff = jnp.maximum(ff, 0.0)
    ff = jnp.dot(ff.astype(jnp.bfloat16), w2_ref[...],
                 preferred_element_type=jnp.float32) + b2_ref[...]
    o_ref[0] = _layernorm(h1 + ff, ln2g_ref[...], ln2b_ref[...]).astype(o_ref.dtype)


def transformer_block(p, x, lengths, n_heads, causal):
    """x: (B, S, D) float; lengths: (B,) int32 -> (B, S, D) bf16."""
    B, S, D = x.shape
    d_ff = p["ff1_w"].shape[1]

    weight_args = (p["wqkv"], p["bqkv"], p["wo"], p["bo"],
                   p["ln1_g"], p["ln1_b"], p["ff1_w"], p["ff1_b"],
                   p["ff2_w"], p["ff2_b"], p["ln2_g"], p["ln2_b"])

    # Weights are constant across the grid: keep them resident in VMEM once
    # (no per-step double-buffering) via memory_space-only BlockSpecs.
    vmem_full = pl.BlockSpec(memory_space=pltpu.MemorySpace.VMEM)

    grid_spec = pltpu.PrefetchScalarGridSpec(
        num_scalar_prefetch=1,
        grid=(B,),
        in_specs=[pl.BlockSpec((1, S, D), lambda b, lens: (b, 0, 0))]
                 + [vmem_full] * len(weight_args),
        out_specs=pl.BlockSpec((1, S, D), lambda b, lens: (b, 0, 0)),
        scratch_shapes=[pltpu.VMEM((S, D), jnp.bfloat16)],   # head-output slab
    )

    flops = int(2 * B * S * D * (4 * D + 2 * d_ff) + 4 * B * S * S * D)
    transcendentals = int(B * n_heads * S * S)
    bytes_accessed = int(x.size * x.dtype.itemsize + B * S * D * 2
                         + sum(int(a.size) * a.dtype.itemsize for a in weight_args))

    return pl.pallas_call(
        functools.partial(_block_kernel, n_heads=n_heads, causal=causal),
        out_shape=jax.ShapeDtypeStruct((B, S, D), jnp.bfloat16),
        grid_spec=grid_spec,
        compiler_params=pltpu.CompilerParams(
            dimension_semantics=("parallel",),        # batch sharded over v7x TCs
            vmem_limit_bytes=32 * 1024 * 1024),       # raise v5e's 16 MiB default
        cost_estimate=pl.CostEstimate(flops=flops,
                                      transcendentals=transcendentals,
                                      bytes_accessed=bytes_accessed),
    )(lengths, x, *weight_args)


# -------------------- fused mu/logvar/reparameterize/z_proj ------------------

def _latent_kernel(cls_ref, wml_ref, bml_ref, eps_ref, wz_ref, bz_ref,
                   mu_ref, lv_ref, zd_ref, *, latent):
    cls = cls_ref[...].astype(jnp.bfloat16)          # (B, D) bf16 from encoder
    ml = jnp.dot(cls, wml_ref[...],
                 preferred_element_type=jnp.float32) + bml_ref[...]
    mu = ml[:, :latent]
    logvar = ml[:, latent:]
    z = mu + eps_ref[...] * jnp.exp(0.5 * logvar)    # reparameterize (f32)
    zd_ref[...] = (jnp.dot(z.astype(jnp.bfloat16), wz_ref[...],
                           preferred_element_type=jnp.float32) + bz_ref[...])
    mu_ref[...] = mu
    lv_ref[...] = logvar


def latent_forward(cls, wml, bml, eps, wz, bz, latent_size):
    # TODO(synk): split over B (or fuse into the decoder prologue) so v7x's two
    # TensorCores both get work; at these sizes the call is overhead-dominated.
    B, D = cls.shape
    L = latent_size
    return pl.pallas_call(
        functools.partial(_latent_kernel, latent=L),
        out_shape=(jax.ShapeDtypeStruct((B, L), jnp.float32),
                   jax.ShapeDtypeStruct((B, L), jnp.float32),
                   jax.ShapeDtypeStruct((B, D), jnp.float32)),
        grid=(1,),
        in_specs=[
            pl.BlockSpec((B, D), lambda i: (0, 0)),
            pl.BlockSpec((D, 2 * L), lambda i: (0, 0)),
            pl.BlockSpec((1, 2 * L), lambda i: (0, 0)),
            pl.BlockSpec((B, L), lambda i: (0, 0)),
            pl.BlockSpec((L, D), lambda i: (0, 0)),
            pl.BlockSpec((1, D), lambda i: (0, 0)),
        ],
        out_specs=(
            pl.BlockSpec((B, L), lambda i: (0, 0)),
            pl.BlockSpec((B, L), lambda i: (0, 0)),
            pl.BlockSpec((B, D), lambda i: (0, 0)),
        ),
    )(cls, wml, bml, eps, wz, bz)


# -------------------------- tiled output projection --------------------------

def _matmul_kernel(x_ref, w_ref, b_ref, o_ref, acc_ref):
    k = pl.program_id(2)

    @pl.when(k == 0)
    def _():
        acc_ref[...] = jnp.zeros_like(acc_ref)

    # x and w arrive bf16 -> native bf16 MXU pass, f32 accumulation.
    acc_ref[...] += jnp.dot(x_ref[...], w_ref[...],
                            preferred_element_type=jnp.float32)

    @pl.when(k == pl.num_programs(2) - 1)
    def _():
        o_ref[...] = (acc_ref[...] + b_ref[...]).astype(o_ref.dtype)


def _pick_tile(dim, candidates):
    for c in candidates:
        if dim >= c and dim % c == 0:
            return c
    return dim


def tiled_linear(x, w, b):
    """x: (M, K) bf16, w: (K, N) bf16, b: (1, N) f32 -> (M, N) f32.
    M/N axes 'parallel', K reduction accumulates into a VMEM f32 scratch.
    M is padded to a multiple of 8 and N to a multiple of 128 so the output
    spec stays lane-dense (unmasked vst) and tile fallbacks stay bounded."""
    if x.dtype != jnp.bfloat16:
        x = x.astype(jnp.bfloat16)
    M, K = x.shape
    N = w.shape[1]

    M_pad = -(-M // 8) * 8
    N_pad = -(-N // 128) * 128
    if M_pad != M:
        x = jnp.pad(x, ((0, M_pad - M), (0, 0)))
    if N_pad != N:
        w = jnp.pad(w, ((0, 0), (0, N_pad - N)))
        b = jnp.pad(b, ((0, 0), (0, N_pad - N)))

    tm = _pick_tile(M_pad, (512, 256, 128, 64, 32, 16, 8))
    tn = _pick_tile(N_pad, (1024, 512, 256, 128))
    tk = _pick_tile(K, (512, 256, 128))          # fallback = full K (legal block)
    grid = (M_pad // tm, N_pad // tn, K // tk)

    out = pl.pallas_call(
        _matmul_kernel,
        out_shape=jax.ShapeDtypeStruct((M_pad, N_pad), jnp.float32),
        grid_spec=pltpu.PrefetchScalarGridSpec(
            num_scalar_prefetch=0,
            grid=grid,
            in_specs=[
                pl.BlockSpec((tm, tk), lambda i, j, k: (i, k)),
                pl.BlockSpec((tk, tn), lambda i, j, k: (k, j)),
                pl.BlockSpec((1, tn), lambda i, j, k: (0, j)),
            ],
            out_specs=pl.BlockSpec((tm, tn), lambda i, j, k: (i, j)),
            scratch_shapes=[pltpu.VMEM((tm, tn), jnp.float32)],
        ),
        compiler_params=pltpu.CompilerParams(
            dimension_semantics=("parallel", "parallel", "arbitrary")),
        cost_estimate=pl.CostEstimate(
            flops=int(2 * M_pad * K * N_pad),
            transcendentals=0,
            bytes_accessed=int(M_pad * K * 2 + K * N_pad * 2 + M_pad * N_pad * 4)),
    )(x, w, b)
    return out[:M, :N]


# ------------------------------ parameters ----------------------------------

def _dense_init(key, din, dout, scale=0.02):
    w = (scale * jax.random.normal(key, (din, dout), jnp.float32)).astype(jnp.bfloat16)
    b = jnp.zeros((1, dout), jnp.float32)
    return w, b


def block_init(key, d_model, d_ff):
    ks = jax.random.split(key, 4)
    wqkv, bqkv = _dense_init(ks[0], d_model, 3 * d_model)   # fused Q|K|V
    wo, bo = _dense_init(ks[1], d_model, d_model)
    w1, b1 = _dense_init(ks[2], d_model, d_ff)
    w2, b2 = _dense_init(ks[3], d_ff, d_model)
    return {
        "wqkv": wqkv, "bqkv": bqkv, "wo": wo, "bo": bo,
        "ln1_g": jnp.ones((1, d_model), jnp.float32),
        "ln1_b": jnp.zeros((1, d_model), jnp.float32),
        "ff1_w": w1, "ff1_b": b1, "ff2_w": w2, "ff2_b": b2,
        "ln2_g": jnp.ones((1, d_model), jnp.float32),
        "ln2_b": jnp.zeros((1, d_model), jnp.float32),
    }


def init_params(key, vocab_size, d_model, latent_size, d_ff, max_len):
    ks = jax.random.split(key, 9)
    wml, bml = _dense_init(ks[6], d_model, 2 * latent_size)  # fused mu|logvar
    wz, bz = _dense_init(ks[7], latent_size, d_model)
    wout, bout = _dense_init(ks[8], d_model, vocab_size)
    return {
        "enc_emb": 0.02 * jax.random.normal(ks[0], (vocab_size, d_model), jnp.float32),
        "enc_pos": 0.02 * jax.random.normal(ks[1], (max_len, d_model), jnp.float32),
        "enc_block": block_init(ks[2], d_model, d_ff),
        "dec_emb": 0.02 * jax.random.normal(ks[3], (vocab_size, d_model), jnp.float32),
        "dec_pos": 0.02 * jax.random.normal(ks[4], (max_len, d_model), jnp.float32),
        "dec_block": block_init(ks[5], d_model, d_ff),
        "w_mulogvar": wml, "b_mulogvar": bml,
        "w_zproj": wz, "b_zproj": bz,
        "w_out": wout, "b_out": bout,
    }


# ------------------------------- forward pass --------------------------------

def vae_transformer_forward(params, encoder_sequences, decoder_sequences,
                            encoder_sequence_lengths, decoder_sequence_lengths,
                            eps, *, n_heads, vocab_size, latent_size):
    B, S = encoder_sequences.shape
    D = params["enc_emb"].shape[1]

    # TODO(synk): token-embedding gather + positional add stay in plain JAX
    # (random-access gather has no efficient rectangular BlockSpec at this scale).
    x = params["enc_emb"][encoder_sequences] + params["enc_pos"][None, :S, :]
    enc_out = transformer_block(params["enc_block"], x,
                                encoder_sequence_lengths, n_heads, causal=False)

    cls_token = enc_out[:, 0, :]                               # (B, D) bf16
    mu, logvar, z_d = latent_forward(cls_token, params["w_mulogvar"],
                                     params["b_mulogvar"], eps,
                                     params["w_zproj"], params["b_zproj"],
                                     latent_size)

    Sd = decoder_sequences.shape[1]
    xd = (params["dec_emb"][decoder_sequences]
          + params["dec_pos"][None, :Sd, :]
          + z_d[:, None, :])
    dec_out = transformer_block(params["dec_block"], xd,
                                decoder_sequence_lengths, n_heads, causal=True)

    logits = tiled_linear(dec_out.reshape(B * Sd, D),                # bf16 acts
                          params["w_out"], params["b_out"])
    return logits.reshape(B, Sd, vocab_size), mu, logvar


# ---------------------------------- main -------------------------------------

if __name__ == "__main__":
    B, S = 2, 8
    d_model, latent_size, d_ff, n_heads = 32, 16, 64, 4
    vocab_size, max_len = 64, 8

    root = jax.random.PRNGKey(0)
    k_params, k_enc, k_dec, k_eps = jax.random.split(root, 4)

    params = init_params(k_params, vocab_size, d_model, latent_size, d_ff, max_len)

    enc_tokens = jax.random.randint(k_enc, (B, S), 0, vocab_size, dtype=jnp.int32)
    dec_tokens = jax.random.randint(k_dec, (B, S), 0, vocab_size, dtype=jnp.int32)
    enc_lengths = jnp.array([8, 5], dtype=jnp.int32)
    dec_lengths = jnp.array([8, 6], dtype=jnp.int32)
    # randn_like(std) from the PyTorch reparameterize, drawn deterministically here.
    eps = jax.random.normal(k_eps, (B, latent_size), jnp.float32)

    fwd = jax.jit(functools.partial(vae_transformer_forward,
                                    n_heads=n_heads, vocab_size=vocab_size,
                                    latent_size=latent_size))
    dec_out, mu, logvar = fwd(params, enc_tokens, dec_tokens,
                              enc_lengths, dec_lengths, eps)

    jax.block_until_ready((dec_out, mu, logvar))
    assert dec_out.shape == (B, S, vocab_size)
    assert mu.shape == (B, latent_size) and logvar.shape == (B, latent_size)
    assert bool(jnp.isfinite(dec_out).all()) and bool(jnp.isfinite(mu).all())
    assert bool(jnp.isfinite(logvar).all())
    print("KERNEL_OK")
</pallas_src>

<mosaic_0001>
module attributes {stable_mosaic.version = 11 : i64} {
  func.func @_block_kernel(%arg0: i32, %arg1: memref<2xi32, #tpu.memory_space<smem>>, %arg2: memref<1x8x32xf32, #tpu.memory_space<vmem>>, %arg3: memref<32x96xbf16, #tpu.memory_space<vmem>>, %arg4: memref<1x96xf32, #tpu.memory_space<vmem>>, %arg5: memref<32x32xbf16, #tpu.memory_space<vmem>>, %arg6: memref<1x32xf32, #tpu.memory_space<vmem>>, %arg7: memref<1x32xf32, #tpu.memory_space<vmem>>, %arg8: memref<1x32xf32, #tpu.memory_space<vmem>>, %arg9: memref<32x64xbf16, #tpu.memory_space<vmem>>, %arg10: memref<1x64xf32, #tpu.memory_space<vmem>>, %arg11: memref<64x32xbf16, #tpu.memory_space<vmem>>, %arg12: memref<1x32xf32, #tpu.memory_space<vmem>>, %arg13: memref<1x32xf32, #tpu.memory_space<vmem>>, %arg14: memref<1x32xf32, #tpu.memory_space<vmem>>, %arg15: memref<1x8x32xbf16, #tpu.memory_space<vmem>>, %arg16: memref<8x32xbf16, #tpu.memory_space<vmem>>) attributes {dimension_semantics = [#tpu.dimension_semantics<parallel>], iteration_bounds = array<i64: 2>, scalar_prefetch = 1 : i64, scratch_operands = 1 : i64, tpu.core_type = #tpu.core_type<tc>, window_params = [{transform_indices = @transform_0, window_bounds = array<i64: 1, 8, 32>}, {pipeline_mode = #tpu.pipeline_mode<synchronous>, transform_indices = @transform_1, window_bounds = array<i64: 32, 96>}, {pipeline_mode = #tpu.pipeline_mode<synchronous>, transform_indices = @transform_2, window_bounds = array<i64: 1, 96>}, {pipeline_mode = #tpu.pipeline_mode<synchronous>, transform_indices = @transform_3, window_bounds = array<i64: 32, 32>}, {pipeline_mode = #tpu.pipeline_mode<synchronous>, transform_indices = @transform_4, window_bounds = array<i64: 1, 32>}, {pipeline_mode = #tpu.pipeline_mode<synchronous>, transform_indices = @transform_5, window_bounds = array<i64: 1, 32>}, {pipeline_mode = #tpu.pipeline_mode<synchronous>, transform_indices = @transform_6, window_bounds = array<i64: 1, 32>}, {pipeline_mode = #tpu.pipeline_mode<synchronous>, transform_indices = @transform_7, window_bounds = array<i64: 32, 64>}, {pipeline_mode = #tpu.pipeline_mode<synchronous>, transform_indices = @transform_8, window_bounds = array<i64: 1, 64>}, {pipeline_mode = #tpu.pipeline_mode<synchronous>, transform_indices = @transform_9, window_bounds = array<i64: 64, 32>}, {pipeline_mode = #tpu.pipeline_mode<synchronous>, transform_indices = @transform_10, window_bounds = array<i64: 1, 32>}, {pipeline_mode = #tpu.pipeline_mode<synchronous>, transform_indices = @transform_11, window_bounds = array<i64: 1, 32>}, {pipeline_mode = #tpu.pipeline_mode<synchronous>, transform_indices = @transform_12, window_bounds = array<i64: 1, 32>}, {transform_indices = @transform_13, window_bounds = array<i64: 1, 8, 32>}]} {
    %0 = arith.index_cast %arg0 : i32 to index
    %1 = memref.load %arg1[%0] : memref<2xi32, #tpu.memory_space<smem>>
    %c0 = arith.constant 0 : index
    %c0_0 = arith.constant 0 : index
    %c0_1 = arith.constant 0 : index
    %2 = vector.load %arg2[%c0, %c0_0, %c0_1] : memref<1x8x32xf32, #tpu.memory_space<vmem>>, vector<1x8x32xf32>
    %3 = vector.shape_cast %2 : vector<1x8x32xf32> to vector<8x32xf32>
    %4 = arith.truncf %3 : vector<8x32xf32> to vector<8x32xbf16>
    %c0_2 = arith.constant 0 : index
    %c0_3 = arith.constant 0 : index
    %5 = vector.load %arg3[%c0_2, %c0_3] : memref<32x96xbf16, #tpu.memory_space<vmem>>, vector<32x96xbf16>
    %cst = arith.constant dense<0.000000e+00> : vector<8x96xf32>
    %6 = tpu.matmul %4, %5, %cst {dimension_numbers = #tpu.dot_dimension_numbers<[1], [0], [0], [1], [0, 0, 1, 1], [], []>} : vector<8x32xbf16>, vector<32x96xbf16>, vector<8x96xf32> -> vector<8x96xf32>
    %c0_4 = arith.constant 0 : index
    %c0_5 = arith.constant 0 : index
    %7 = vector.load %arg4[%c0_4, %c0_5] : memref<1x96xf32, #tpu.memory_space<vmem>>, vector<1x96xf32>
    %8 = vector.broadcast %7 : vector<1x96xf32> to vector<8x96xf32>
    %9 = arith.addf %6, %8 : vector<8x96xf32>
    %10 = vector.extract_strided_slice %9 {offsets = [0, 0], sizes = [8, 32], strides = [1, 1]} : vector<8x96xf32> to vector<8x32xf32>
    %11 = vector.extract_strided_slice %9 {offsets = [0, 32], sizes = [8, 32], strides = [1, 1]} : vector<8x96xf32> to vector<8x32xf32>
    %12 = vector.extract_strided_slice %9 {offsets = [0, 64], sizes = [8, 32], strides = [1, 1]} : vector<8x96xf32> to vector<8x32xf32>
    %13 = tpu.iota {dimensions = array<i32: 1>} : vector<8x8xi32>
    %14 = vector.broadcast %1 : i32 to vector<8x8xi32>
    %15 = arith.cmpi slt, %13, %14 : vector<8x8xi32>
    %cst_6 = arith.constant 0.000000e+00 : f32
    %cst_7 = arith.constant -1.000000e+09 : f32
    %16 = vector.broadcast %cst_6 : f32 to vector<8x8xf32>
    %17 = vector.broadcast %cst_7 : f32 to vector<8x8xf32>
    %18 = arith.select %15, %16, %17 : vector<8x8xi1>, vector<8x8xf32>
    %19 = tpu.iota {dimensions = array<i32: 0>} : vector<8x8xi32>
    %20 = arith.cmpi sge, %19, %13 : vector<8x8xi32>
    %cst_8 = arith.constant -1.000000e+09 : f32
    %21 = vector.broadcast %cst_8 : f32 to vector<8x8xf32>
    %22 = arith.select %20, %18, %21 : vector<8x8xi1>, vector<8x8xf32>
    %23 = vector.extract_strided_slice %10 {offsets = [0, 0], sizes = [8, 8], strides = [1, 1]} : vector<8x32xf32> to vector<8x8xf32>
    %24 = arith.truncf %23 : vector<8x8xf32> to vector<8x8xbf16>
    %25 = vector.extract_strided_slice %11 {offsets = [0, 0], sizes = [8, 8], strides = [1, 1]} : vector<8x32xf32> to vector<8x8xf32>
    %26 = arith.truncf %25 : vector<8x8xf32> to vector<8x8xbf16>
    %27 = vector.extract_strided_slice %12 {offsets = [0, 0], sizes = [8, 8], strides = [1, 1]} : vector<8x32xf32> to vector<8x8xf32>
    %28 = arith.truncf %27 : vector<8x8xf32> to vector<8x8xbf16>
    %cst_9 = arith.constant dense<0.000000e+00> : vector<8x8xf32>
    %29 = tpu.matmul %24, %26, %cst_9 {dimension_numbers = #tpu.dot_dimension_numbers<[1], [1], [0], [0], [0, 0, 1, 0], [], []>} : vector<8x8xbf16>, vector<8x8xbf16>, vector<8x8xf32> -> vector<8x8xf32>
    %cst_10 = arith.constant 0.353553385 : f32
    %30 = vector.broadcast %cst_10 : f32 to vector<8x8xf32>
    %31 = arith.mulf %29, %30 : vector<8x8xf32>
    %32 = arith.addf %31, %22 : vector<8x8xf32>
    %cst_11 = arith.constant dense<0xFF800000> : vector<8xf32>
    %33 = vector.multi_reduction <maximumf>, %32, %cst_11 [1] : vector<8x8xf32> to vector<8xf32>
    %34 = vector.shape_cast %33 : vector<8xf32> to vector<8x1xf32>
    %35 = vector.broadcast %34 : vector<8x1xf32> to vector<8x8xf32>
    %36 = arith.subf %32, %35 : vector<8x8xf32>
    %37 = math.exp %36 : vector<8x8xf32>
    %cst_12 = arith.constant dense<0.000000e+00> : vector<8xf32>
    %38 = vector.multi_reduction <add>, %37, %cst_12 [1] : vector<8x8xf32> to vector<8xf32>
    %39 = vector.shape_cast %38 : vector<8xf32> to vector<8x1xf32>
    %40 = tpu.reciprocal %39 {approx = true} : vector<8x1xf32> -> vector<8x1xf32>
    %41 = vector.broadcast %40 : vector<8x1xf32> to vector<8x8xf32>
    %42 = arith.mulf %37, %41 : vector<8x8xf32>
    %43 = arith.truncf %42 : vector<8x8xf32> to vector<8x8xbf16>
    %cst_13 = arith.constant dense<0.000000e+00> : vector<8x8xf32>
    %44 = tpu.matmul %43, %28, %cst_13 {dimension_numbers = #tpu.dot_dimension_numbers<[1], [0], [0], [1], [0, 0, 1, 1], [], []>} : vector<8x8xbf16>, vector<8x8xbf16>, vector<8x8xf32> -> vector<8x8xf32>
    %45 = arith.truncf %44 : vector<8x8xf32> to vector<8x8xbf16>
    %c0_14 = arith.constant 0 : index
    %c0_15 = arith.constant 0 : index
    %46 = vector.load %arg16[%c0_14, %c0_15] : memref<8x32xbf16, #tpu.memory_space<vmem>>, vector<8x8xbf16>
    tpu.vector_store %arg16[%c0_14, %c0_15], %45 {strides = array<i32>} : memref<8x32xbf16, #tpu.memory_space<vmem>>, vector<8x8xbf16>,
    %47 = vector.extract_strided_slice %10 {offsets = [0, 8], sizes = [8, 8], strides = [1, 1]} : vector<8x32xf32> to vector<8x8xf32>
    %48 = arith.truncf %47 : vector<8x8xf32> to vector<8x8xbf16>
    %49 = vector.extract_strided_slice %11 {offsets = [0, 8], sizes = [8, 8], strides = [1, 1]} : vector<8x32xf32> to vector<8x8xf32>
    %50 = arith.truncf %49 : vector<8x8xf32> to vector<8x8xbf16>
    %51 = vector.extract_strided_slice %12 {offsets = [0, 8], sizes = [8, 8], strides = [1, 1]} : vector<8x32xf32> to vector<8x8xf32>
    %52 = arith.truncf %51 : vector<8x8xf32> to vector<8x8xbf16>
    %cst_16 = arith.constant dense<0.000000e+00> : vector<8x8xf32>
    %53 = tpu.matmul %48, %50, %cst_16 {dimension_numbers = #tpu.dot_dimension_numbers<[1], [1], [0], [0], [0, 0, 1, 0], [], []>} : vector<8x8xbf16>, vector<8x8xbf16>, vector<8x8xf32> -> vector<8x8xf32>
    %cst_17 = arith.constant 0.353553385 : f32
    %54 = vector.broadcast %cst_17 : f32 to vector<8x8xf32>
    %55 = arith.mulf %53, %54 : vector<8x8xf32>
    %56 = arith.addf %55, %22 : vector<8x8xf32>
    %cst_18 = arith.constant dense<0xFF800000> : vector<8xf32>
    %57 = vector.multi_reduction <maximumf>, %56, %cst_18 [1] : vector<8x8xf32> to vector<8xf32>
    %58 = vector.shape_cast %57 : vector<8xf32> to vector<8x1xf32>
    %59 = vector.broadcast %58 : vector<8x1xf32> to vector<8x8xf32>
    %60 = arith.subf %56, %59 : vector<8x8xf32>
    %61 = math.exp %60 : vector<8x8xf32>
    %cst_19 = arith.constant dense<0.000000e+00> : vector<8xf32>
    %62 = vector.multi_reduction <add>, %61, %cst_19 [1] : vector<8x8xf32> to vector<8xf32>
    %63 = vector.shape_cast %62 : vector<8xf32> to vector<8x1xf32>
    %64 = tpu.reciprocal %63 {approx = true} : vector<8x1xf32> -> vector<8x1xf32>
    %65 = vector.broadcast %64 : vector<8x1xf32> to vector<8x8xf32>
    %66 = arith.mulf %61, %65 : vector<8x8xf32>
    %67 = arith.truncf %66 : vector<8x8xf32> to vector<8x8xbf16>
    %cst_20 = arith.constant dense<0.000000e+00> : vector<8x8xf32>
    %68 = tpu.matmul %67, %52, %cst_20 {dimension_numbers = #tpu.dot_dimension_numbers<[1], [0], [0], [1], [0, 0, 1, 1], [], []>} : vector<8x8xbf16>, vector<8x8xbf16>, vector<8x8xf32> -> vector<8x8xf32>
    %69 = arith.truncf %68 : vector<8x8xf32> to vector<8x8xbf16>
    %c0_21 = arith.constant 0 : index
    %c8 = arith.constant 8 : index
    %70 = vector.load %arg16[%c0_21, %c8] : memref<8x32xbf16, #tpu.memory_space<vmem>>, vector<8x8xbf16>
    tpu.vector_store %arg16[%c0_21, %c8], %69 {strides = array<i32>} : memref<8x32xbf16, #tpu.memory_space<vmem>>, vector<8x8xbf16>,
    %71 = vector.extract_strided_slice %10 {offsets = [0, 16], sizes = [8, 8], strides = [1, 1]} : vector<8x32xf32> to vector<8x8xf32>
    %72 = arith.truncf %71 : vector<8x8xf32> to vector<8x8xbf16>
    %73 = vector.extract_strided_slice %11 {offsets = [0, 16], sizes = [8, 8], strides = [1, 1]} : vector<8x32xf32> to vector<8x8xf32>
    %74 = arith.truncf %73 : vector<8x8xf32> to vector<8x8xbf16>
    %75 = vector.extract_strided_slice %12 {offsets = [0, 16], sizes = [8, 8], strides = [1, 1]} : vector<8x32xf32> to vector<8x8xf32>
    %76 = arith.truncf %75 : vector<8x8xf32> to vector<8x8xbf16>
    %cst_22 = arith.constant dense<0.000000e+00> : vector<8x8xf32>
    %77 = tpu.matmul %72, %74, %cst_22 {dimension_numbers = #tpu.dot_dimension_numbers<[1], [1], [0], [0], [0, 0, 1, 0], [], []>} : vector<8x8xbf16>, vector<8x8xbf16>, vector<8x8xf32> -> vector<8x8xf32>
    %cst_23 = arith.constant 0.353553385 : f32
    %78 = vector.broadcast %cst_23 : f32 to vector<8x8xf32>
    %79 = arith.mulf %77, %78 : vector<8x8xf32>
    %80 = arith.addf %79, %22 : vector<8x8xf32>
    %cst_24 = arith.constant dense<0xFF800000> : vector<8xf32>
    %81 = vector.multi_reduction <maximumf>, %80, %cst_24 [1] : vector<8x8xf32> to vector<8xf32>
    %82 = vector.shape_cast %81 : vector<8xf32> to vector<8x1xf32>
    %83 = vector.broadcast %82 : vector<8x1xf32> to vector<8x8xf32>
    %84 = arith.subf %80, %83 : vector<8x8xf32>
    %85 = math.exp %84 : vector<8x8xf32>
    %cst_25 = arith.constant dense<0.000000e+00> : vector<8xf32>
    %86 = vector.multi_reduction <add>, %85, %cst_25 [1] : vector<8x8xf32> to vector<8xf32>
    %87 = vector.shape_cast %86 : vector<8xf32> to vector<8x1xf32>
    %88 = tpu.reciprocal %87 {approx = true} : vector<8x1xf32> -> vector<8x1xf32>
    %89 = vector.broadcast %88 : vector<8x1xf32> to vector<8x8xf32>
    %90 = arith.mulf %85, %89 : vector<8x8xf32>
    %91 = arith.truncf %90 : vector<8x8xf32> to vector<8x8xbf16>
    %cst_26 = arith.constant dense<0.000000e+00> : vector<8x8xf32>
    %92 = tpu.matmul %91, %76, %cst_26 {dimension_numbers = #tpu.dot_dimension_numbers<[1], [0], [0], [1], [0, 0, 1, 1], [], []>} : vector<8x8xbf16>, vector<8x8xbf16>, vector<8x8xf32> -> vector<8x8xf32>
    %93 = arith.truncf %92 : vector<8x8xf32> to vector<8x8xbf16>
    %c0_27 = arith.constant 0 : index
    %c16 = arith.constant 16 : index
    %94 = vector.load %arg16[%c0_27, %c16] : memref<8x32xbf16, #tpu.memory_space<vmem>>, vector<8x8xbf16>
    tpu.vector_store %arg16[%c0_27, %c16], %93 {strides = array<i32>} : memref<8x32xbf16, #tpu.memory_space<vmem>>, vector<8x8xbf16>,
    %95 = vector.extract_strided_slice %10 {offsets = [0, 24], sizes = [8, 8], strides = [1, 1]} : vector<8x32xf32> to vector<8x8xf32>
    %96 = arith.truncf %95 : vector<8x8xf32> to vector<8x8xbf16>
    %97 = vector.extract_strided_slice %11 {offsets = [0, 24], sizes = [8, 8], strides = [1, 1]} : vector<8x32xf32> to vector<8x8xf32>
    %98 = arith.truncf %97 : vector<8x8xf32> to vector<8x8xbf16>
    %99 = vector.extract_strided_slice %12 {offsets = [0, 24], sizes = [8, 8], strides = [1, 1]} : vector<8x32xf32> to vector<8x8xf32>
    %100 = arith.truncf %99 : vector<8x8xf32> to vector<8x8xbf16>
    %cst_28 = arith.constant dense<0.000000e+00> : vector<8x8xf32>
    %101 = tpu.matmul %96, %98, %cst_28 {dimension_numbers = #tpu.dot_dimension_numbers<[1], [1], [0], [0], [0, 0, 1, 0], [], []>} : vector<8x8xbf16>, vector<8x8xbf16>, vector<8x8xf32> -> vector<8x8xf32>
    %cst_29 = arith.constant 0.353553385 : f32
    %102 = vector.broadcast %cst_29 : f32 to vector<8x8xf32>
    %103 = arith.mulf %101, %102 : vector<8x8xf32>
    %104 = arith.addf %103, %22 : vector<8x8xf32>
    %cst_30 = arith.constant dense<0xFF800000> : vector<8xf32>
    %105 = vector.multi_reduction <maximumf>, %104, %cst_30 [1] : vector<8x8xf32> to vector<8xf32>
    %106 = vector.shape_cast %105 : vector<8xf32> to vector<8x1xf32>
    %107 = vector.broadcast %106 : vector<8x1xf32> to vector<8x8xf32>
    %108 = arith.subf %104, %107 : vector<8x8xf32>
    %109 = math.exp %108 : vector<8x8xf32>
    %cst_31 = arith.constant dense<0.000000e+00> : vector<8xf32>
    %110 = vector.multi_reduction <add>, %109, %cst_31 [1] : vector<8x8xf32> to vector<8xf32>
    %111 = vector.shape_cast %110 : vector<8xf32> to vector<8x1xf32>
    %112 = tpu.reciprocal %111 {approx = true} : vector<8x1xf32> -> vector<8x1xf32>
    %113 = vector.broadcast %112 : vector<8x1xf32> to vector<8x8xf32>
    %114 = arith.mulf %109, %113 : vector<8x8xf32>
    %115 = arith.truncf %114 : vector<8x8xf32> to vector<8x8xbf16>
    %cst_32 = arith.constant dense<0.000000e+00> : vector<8x8xf32>
    %116 = tpu.matmul %115, %100, %cst_32 {dimension_numbers = #tpu.dot_dimension_numbers<[1], [0], [0], [1], [0, 0, 1, 1], [], []>} : vector<8x8xbf16>, vector<8x8xbf16>, vector<8x8xf32> -> vector<8x8xf32>
    %117 = arith.truncf %116 : vector<8x8xf32> to vector<8x8xbf16>
    %c0_33 = arith.constant 0 : index
    %c24 = arith.constant 24 : index
    %118 = vector.load %arg16[%c0_33, %c24] : memref<8x32xbf16, #tpu.memory_space<vmem>>, vector<8x8xbf16>
    tpu.vector_store %arg16[%c0_33, %c24], %117 {strides = array<i32>} : memref<8x32xbf16, #tpu.memory_space<vmem>>, vector<8x8xbf16>,
    %c0_34 = arith.constant 0 : index
    %c0_35 = arith.constant 0 : index
    %119 = vector.load %arg16[%c0_34, %c0_35] : memref<8x32xbf16, #tpu.memory_space<vmem>>, vector<8x32xbf16>
    %c0_36 = arith.constant 0 : index
    %c0_37 = arith.constant 0 : index
    %120 = vector.load %arg5[%c0_36, %c0_37] : memref<32x32xbf16, #tpu.memory_space<vmem>>, vector<32x32xbf16>
    %cst_38 = arith.constant dense<0.000000e+00> : vector<8x32xf32>
    %121 = tpu.matmul %119, %120, %cst_38 {dimension_numbers = #tpu.dot_dimension_numbers<[1], [0], [0], [1], [0, 0, 1, 1], [], []>} : vector<8x32xbf16>, vector<32x32xbf16>, vector<8x32xf32> -> vector<8x32xf32>
    %c0_39 = arith.constant 0 : index
    %c0_40 = arith.constant 0 : index
    %122 = vector.load %arg6[%c0_39, %c0_40] : memref<1x32xf32, #tpu.memory_space<vmem>>, vector<1x32xf32>
    %123 = vector.broadcast %122 : vector<1x32xf32> to vector<8x32xf32>
    %124 = arith.addf %121, %123 : vector<8x32xf32>
    %125 = arith.addf %3, %124 : vector<8x32xf32>
    %c0_41 = arith.constant 0 : index
    %c0_42 = arith.constant 0 : index
    %126 = vector.load %arg7[%c0_41, %c0_42] : memref<1x32xf32, #tpu.memory_space<vmem>>, vector<1x32xf32>
    %c0_43 = arith.constant 0 : index
    %c0_44 = arith.constant 0 : index
    %127 = vector.load %arg8[%c0_43, %c0_44] : memref<1x32xf32, #tpu.memory_space<vmem>>, vector<1x32xf32>
    %cst_45 = arith.constant dense<0.000000e+00> : vector<8xf32>
    %128 = vector.multi_reduction <add>, %125, %cst_45 [1] : vector<8x32xf32> to vector<8xf32>
    %129 = vector.shape_cast %128 : vector<8xf32> to vector<8x1xf32>
    %cst_46 = arith.constant 3.200000e+01 : f32
    %130 = vector.broadcast %cst_46 : f32 to vector<8x1xf32>
    %131 = arith.divf %129, %130 : vector<8x1xf32>
    %132 = vector.broadcast %131 : vector<8x1xf32> to vector<8x32xf32>
    %133 = arith.subf %125, %132 : vector<8x32xf32>
    %134 = arith.mulf %133, %133 : vector<8x32xf32>
    %cst_47 = arith.constant dense<0.000000e+00> : vector<8xf32>
    %135 = vector.multi_reduction <add>, %134, %cst_47 [1] : vector<8x32xf32> to vector<8xf32>
    %136 = vector.shape_cast %135 : vector<8xf32> to vector<8x1xf32>
    %cst_48 = arith.constant 3.200000e+01 : f32
    %137 = vector.broadcast %cst_48 : f32 to vector<8x1xf32>
    %138 = arith.divf %136, %137 : vector<8x1xf32>
    %139 = vector.broadcast %131 : vector<8x1xf32> to vector<8x32xf32>
    %140 = arith.subf %125, %139 : vector<8x32xf32>
    %cst_49 = arith.constant 9.99999974E-6 : f32
    %141 = vector.broadcast %cst_49 : f32 to vector<8x1xf32>
    %142 = arith.addf %138, %141 : vector<8x1xf32>
    %143 = math.rsqrt %142 : vector<8x1xf32>
    %144 = vector.broadcast %143 : vector<8x1xf32> to vector<8x32xf32>
    %145 = arith.mulf %140, %144 : vector<8x32xf32>
    %146 = vector.broadcast %126 : vector<1x32xf32> to vector<8x32xf32>
    %147 = arith.mulf %145, %146 : vector<8x32xf32>
    %148 = vector.broadcast %127 : vector<1x32xf32> to vector<8x32xf32>
    %149 = arith.addf %147, %148 : vector<8x32xf32>
    %150 = arith.truncf %149 : vector<8x32xf32> to vector<8x32xbf16>
    %c0_50 = arith.constant 0 : index
    %c0_51 = arith.constant 0 : index
    %151 = vector.load %arg9[%c0_50, %c0_51] : memref<32x64xbf16, #tpu.memory_space<vmem>>, vector<32x64xbf16>
    %cst_52 = arith.constant dense<0.000000e+00> : vector<8x64xf32>
    %152 = tpu.matmul %150, %151, %cst_52 {dimension_numbers = #tpu.dot_dimension_numbers<[1], [0], [0], [1], [0, 0, 1, 1], [], []>} : vector<8x32xbf16>, vector<32x64xbf16>, vector<8x64xf32> -> vector<8x64xf32>
    %c0_53 = arith.constant 0 : index
    %c0_54 = arith.constant 0 : index
    %153 = vector.load %arg10[%c0_53, %c0_54] : memref<1x64xf32, #tpu.memory_space<vmem>>, vector<1x64xf32>
    %154 = vector.broadcast %153 : vector<1x64xf32> to vector<8x64xf32>
    %155 = arith.addf %152, %154 : vector<8x64xf32>
    %cst_55 = arith.constant 0.000000e+00 : f32
    %156 = vector.broadcast %cst_55 : f32 to vector<8x64xf32>
    %157 = arith.maximumf %155, %156 : vector<8x64xf32>
    %158 = arith.truncf %157 : vector<8x64xf32> to vector<8x64xbf16>
    %c0_56 = arith.constant 0 : index
    %c0_57 = arith.constant 0 : index
    %159 = vector.load %arg11[%c0_56, %c0_57] : memref<64x32xbf16, #tpu.memory_space<vmem>>, vector<64x32xbf16>
    %cst_58 = arith.constant dense<0.000000e+00> : vector<8x32xf32>
    %160 = tpu.matmul %158, %159, %cst_58 {dimension_numbers = #tpu.dot_dimension_numbers<[1], [0], [0], [1], [0, 0, 1, 1], [], []>} : vector<8x64xbf16>, vector<64x32xbf16>, vector<8x32xf32> -> vector<8x32xf32>
    %c0_59 = arith.constant 0 : index
    %c0_60 = arith.constant 0 : index
    %161 = vector.load %arg12[%c0_59, %c0_60] : memref<1x32xf32, #tpu.memory_space<vmem>>, vector<1x32xf32>
    %162 = vector.broadcast %161 : vector<1x32xf32> to vector<8x32xf32>
    %163 = arith.addf %160, %162 : vector<8x32xf32>
    %164 = arith.addf %149, %163 : vector<8x32xf32>
    %c0_61 = arith.constant 0 : index
    %c0_62 = arith.constant 0 : index
    %165 = vector.load %arg13[%c0_61, %c0_62] : memref<1x32xf32, #tpu.memory_space<vmem>>, vector<1x32xf32>
    %c0_63 = arith.constant 0 : index
    %c0_64 = arith.constant 0 : index
    %166 = vector.load %arg14[%c0_63, %c0_64] : memref<1x32xf32, #tpu.memory_space<vmem>>, vector<1x32xf32>
    %cst_65 = arith.constant dense<0.000000e+00> : vector<8xf32>
    %167 = vector.multi_reduction <add>, %164, %cst_65 [1] : vector<8x32xf32> to vector<8xf32>
    %168 = vector.shape_cast %167 : vector<8xf32> to vector<8x1xf32>
    %cst_66 = arith.constant 3.200000e+01 : f32
    %169 = vector.broadcast %cst_66 : f32 to vector<8x1xf32>
    %170 = arith.divf %168, %169 : vector<8x1xf32>
    %171 = vector.broadcast %170 : vector<8x1xf32> to vector<8x32xf32>
    %172 = arith.subf %164, %171 : vector<8x32xf32>
    %173 = arith.mulf %172, %172 : vector<8x32xf32>
    %cst_67 = arith.constant dense<0.000000e+00> : vector<8xf32>
    %174 = vector.multi_reduction <add>, %173, %cst_67 [1] : vector<8x32xf32> to vector<8xf32>
    %175 = vector.shape_cast %174 : vector<8xf32> to vector<8x1xf32>
    %cst_68 = arith.constant 3.200000e+01 : f32
    %176 = vector.broadcast %cst_68 : f32 to vector<8x1xf32>
    %177 = arith.divf %175, %176 : vector<8x1xf32>
    %178 = vector.broadcast %170 : vector<8x1xf32> to vector<8x32xf32>
    %179 = arith.subf %164, %178 : vector<8x32xf32>
    %cst_69 = arith.constant 9.99999974E-6 : f32
    %180 = vector.broadcast %cst_69 : f32 to vector<8x1xf32>
    %181 = arith.addf %177, %180 : vector<8x1xf32>
    %182 = math.rsqrt %181 : vector<8x1xf32>
    %183 = vector.broadcast %182 : vector<8x1xf32> to vector<8x32xf32>
    %184 = arith.mulf %179, %183 : vector<8x32xf32>
    %185 = vector.broadcast %165 : vector<1x32xf32> to vector<8x32xf32>
    %186 = arith.mulf %184, %185 : vector<8x32xf32>
    %187 = vector.broadcast %166 : vector<1x32xf32> to vector<8x32xf32>
    %188 = arith.addf %186, %187 : vector<8x32xf32>
    %189 = arith.truncf %188 : vector<8x32xf32> to vector<8x32xbf16>
    %c0_70 = arith.constant 0 : index
    %c0_71 = arith.constant 0 : index
    %c0_72 = arith.constant 0 : index
    %190 = vector.load %arg15[%c0_70, %c0_71, %c0_72] : memref<1x8x32xbf16, #tpu.memory_space<vmem>>, vector<1x8x32xbf16>
    %191 = vector.shape_cast %190 : vector<1x8x32xbf16> to vector<8x32xbf16>
    %192 = vector.shape_cast %189 : vector<8x32xbf16> to vector<1x8x32xbf16>
    tpu.vector_store %arg15[%c0_70, %c0_71, %c0_72], %192 {strides = array<i32>} : memref<1x8x32xbf16, #tpu.memory_space<vmem>>, vector<1x8x32xbf16>,
    return
  }
  func.func @transform_0(%arg0: i32, %arg1: memref<2xi32, #tpu.memory_space<smem>>) -> (i32, i32, i32) {
    %c0_i32 = arith.constant 0 : i32
    %c0_i32_0 = arith.constant 0 : i32
    %c0_i32_1 = arith.constant 0 : i32
    return %arg0, %c0_i32, %c0_i32_0 : i32, i32, i32
  }
  func.func @transform_1(%arg0: i32, %arg1: memref<2xi32, #tpu.memory_space<smem>>) -> (i32, i32) {
    %c0_i32 = arith.constant 0 : i32
    %c0_i32_0 = arith.constant 0 : i32
    %c0_i32_1 = arith.constant 0 : i32
    return %c0_i32, %c0_i32_0 : i32, i32
  }
  func.func @transform_2(%arg0: i32, %arg1: memref<2xi32, #tpu.memory_space<smem>>) -> (i32, i32) {
    %c0_i32 = arith.constant 0 : i32
    %c0_i32_0 = arith.constant 0 : i32
    %c0_i32_1 = arith.constant 0 : i32
    return %c0_i32, %c0_i32_0 : i32, i32
  }
  func.func @transform_3(%arg0: i32, %arg1: memref<2xi32, #tpu.memory_space<smem>>) -> (i32, i32) {
    %c0_i32 = arith.constant 0 : i32
    %c0_i32_0 = arith.constant 0 : i32
    %c0_i32_1 = arith.constant 0 : i32
    return %c0_i32, %c0_i32_0 : i32, i32
  }
  func.func @transform_4(%arg0: i32, %arg1: memref<2xi32, #tpu.memory_space<smem>>) -> (i32, i32) {
    %c0_i32 = arith.constant 0 : i32
    %c0_i32_0 = arith.constant 0 : i32
    %c0_i32_1 = arith.constant 0 : i32
    return %c0_i32, %c0_i32_0 : i32, i32
  }
  func.func @transform_5(%arg0: i32, %arg1: memref<2xi32, #tpu.memory_space<smem>>) -> (i32, i32) {
    %c0_i32 = arith.constant 0 : i32
    %c0_i32_0 = arith.constant 0 : i32
    %c0_i32_1 = arith.constant 0 : i32
    return %c0_i32, %c0_i32_0 : i32, i32
  }
  func.func @transform_6(%arg0: i32, %arg1: memref<2xi32, #tpu.memory_space<smem>>) -> (i32, i32) {
    %c0_i32 = arith.constant 0 : i32
    %c0_i32_0 = arith.constant 0 : i32
    %c0_i32_1 = arith.constant 0 : i32
    return %c0_i32, %c0_i32_0 : i32, i32
  }
  func.func @transform_7(%arg0: i32, %arg1: memref<2xi32, #tpu.memory_space<smem>>) -> (i32, i32) {
    %c0_i32 = arith.constant 0 : i32
    %c0_i32_0 = arith.constant 0 : i32
    %c0_i32_1 = arith.constant 0 : i32
    return %c0_i32, %c0_i32_0 : i32, i32
  }
  func.func @transform_8(%arg0: i32, %arg1: memref<2xi32, #tpu.memory_space<smem>>) -> (i32, i32) {
    %c0_i32 = arith.constant 0 : i32
    %c0_i32_0 = arith.constant 0 : i32
    %c0_i32_1 = arith.constant 0 : i32
    return %c0_i32, %c0_i32_0 : i32, i32
  }
  func.func @transform_9(%arg0: i32, %arg1: memref<2xi32, #tpu.memory_space<smem>>) -> (i32, i32) {
    %c0_i32 = arith.constant 0 : i32
    %c0_i32_0 = arith.constant 0 : i32
    %c0_i32_1 = arith.constant 0 : i32
    return %c0_i32, %c0_i32_0 : i32, i32
  }
  func.func @transform_10(%arg0: i32, %arg1: memref<2xi32, #tpu.memory_space<smem>>) -> (i32, i32) {
    %c0_i32 = arith.constant 0 : i32
    %c0_i32_0 = arith.constant 0 : i32
    %c0_i32_1 = arith.constant 0 : i32
    return %c0_i32, %c0_i32_0 : i32, i32
  }
  func.func @transform_11(%arg0: i32, %arg1: memref<2xi32, #tpu.memory_space<smem>>) -> (i32, i32) {
    %c0_i32 = arith.constant 0 : i32
    %c0_i32_0 = arith.constant 0 : i32
    %c0_i32_1 = arith.constant 0 : i32
    return %c0_i32, %c0_i32_0 : i32, i32
  }
  func.func @transform_12(%arg0: i32, %arg1: memref<2xi32, #tpu.memory_space<smem>>) -> (i32, i32) {
    %c0_i32 = arith.constant 0 : i32
    %c0_i32_0 = arith.constant 0 : i32
    %c0_i32_1 = arith.constant 0 : i32
    return %c0_i32, %c0_i32_0 : i32, i32
  }
  func.func @transform_13(%arg0: i32, %arg1: memref<2xi32, #tpu.memory_space<smem>>) -> (i32, i32, i32) {
    %c0_i32 = arith.constant 0 : i32
    %c0_i32_0 = arith.constant 0 : i32
    %c0_i32_1 = arith.constant 0 : i32
    return %arg0, %c0_i32, %c0_i32_0 : i32, i32, i32
  }
}

module attributes {stable_mosaic.version = 11 : i64} {
  func.func @_block_kernel(%arg0: i32, %arg1: memref<2xi32, #tpu.memory_space<smem>>, %arg2: memref<1x8x32xf32, #tpu.memory_space<vmem>>, %arg3: memref<32x96xbf16, #tpu.memory_space<vmem>>, %arg4: memref<1x96xf32, #tpu.memory_space<vmem>>, %arg5: memref<32x32xbf16, #tpu.memory_space<vmem>>, %arg6: memref<1x32xf32, #tpu.memory_space<vmem>>, %arg7: memref<1x32xf32, #tpu.memory_space<vmem>>, %arg8: memref<1x32xf32, #tpu.memory_space<vmem>>, %arg9: memref<32x64xbf16, #tpu.memory_space<vmem>>, %arg10: memref<1x64xf32, #tpu.memory_space<vmem>>, %arg11: memref<64x32xbf16, #tpu.memory_space<vmem>>, %arg12: memref<1x32xf32, #tpu.memory_space<vmem>>, %arg13: memref<1x32xf32, #tpu.memory_space<vmem>>, %arg14: memref<1x32xf32, #tpu.memory_space<vmem>>, %arg15: memref<1x8x32xbf16, #tpu.memory_space<vmem>>, %arg16: memref<8x32xbf16, #tpu.memory_space<vmem>>) attributes {dimension_semantics = [#tpu.dimension_semantics<parallel>], iteration_bounds = array<i64: 2>, scalar_prefetch = 1 : i64, scratch_operands = 1 : i64, tpu.core_type = #tpu.core_type<tc>, window_params = [{transform_indices = @transform_0, window_bounds = array<i64: 1, 8, 32>}, {pipeline_mode = #tpu.pipeline_mode<synchronous>, transform_indices = @transform_1, window_bounds = array<i64: 32, 96>}, {pipeline_mode = #tpu.pipeline_mode<synchronous>, transform_indices = @transform_2, window_bounds = array<i64: 1, 96>}, {pipeline_mode = #tpu.pipeline_mode<synchronous>, transform_indices = @transform_3, window_bounds = array<i64: 32, 32>}, {pipeline_mode = #tpu.pipeline_mode<synchronous>, transform_indices = @transform_4, window_bounds = array<i64: 1, 32>}, {pipeline_mode = #tpu.pipeline_mode<synchronous>, transform_indices = @transform_5, window_bounds = array<i64: 1, 32>}, {pipeline_mode = #tpu.pipeline_mode<synchronous>, transform_indices = @transform_6, window_bounds = array<i64: 1, 32>}, {pipeline_mode = #tpu.pipeline_mode<synchronous>, transform_indices = @transform_7, window_bounds = array<i64: 32, 64>}, {pipeline_mode = #tpu.pipeline_mode<synchronous>, transform_indices = @transform_8, window_bounds = array<i64: 1, 64>}, {pipeline_mode = #tpu.pipeline_mode<synchronous>, transform_indices = @transform_9, window_bounds = array<i64: 64, 32>}, {pipeline_mode = #tpu.pipeline_mode<synchronous>, transform_indices = @transform_10, window_bounds = array<i64: 1, 32>}, {pipeline_mode = #tpu.pipeline_mode<synchronous>, transform_indices = @transform_11, window_bounds = array<i64: 1, 32>}, {pipeline_mode = #tpu.pipeline_mode<synchronous>, transform_indices = @transform_12, window_bounds = array<i64: 1, 32>}, {transform_indices = @transform_13, window_bounds = array<i64: 1, 8, 32>}]} {
    %0 = arith.index_cast %arg0 : i32 to index
    %1 = memref.load %arg1[%0] : memref<2xi32, #tpu.memory_space<smem>>
    %c0 = arith.constant 0 : index
    %c0_0 = arith.constant 0 : index
    %c0_1 = arith.constant 0 : index
    %2 = vector.load %arg2[%c0, %c0_0, %c0_1] : memref<1x8x32xf32, #tpu.memory_space<vmem>>, vector<1x8x32xf32>
    %3 = vector.shape_cast %2 : vector<1x8x32xf32> to vector<8x32xf32>
    %4 = arith.truncf %3 : vector<8x32xf32> to vector<8x32xbf16>
    %c0_2 = arith.constant 0 : index
    %c0_3 = arith.constant 0 : index
    %5 = vector.load %arg3[%c0_2, %c0_3] : memref<32x96xbf16, #tpu.memory_space<vmem>>, vector<32x96xbf16>
    %cst = arith.constant dense<0.000000e+00> : vector<8x96xf32>
    %6 = tpu.matmul %4, %5, %cst {dimension_numbers = #tpu.dot_dimension_numbers<[1], [0], [0], [1], [0, 0, 1, 1], [], []>} : vector<8x32xbf16>, vector<32x96xbf16>, vector<8x96xf32> -> vector<8x96xf32>
    %c0_4 = arith.constant 0 : index
    %c0_5 = arith.constant 0 : index
    %7 = vector.load %arg4[%c0_4, %c0_5] : memref<1x96xf32, #tpu.memory_space<vmem>>, vector<1x96xf32>
    %8 = vector.broadcast %7 : vector<1x96xf32> to vector<8x96xf32>
    %9 = arith.addf %6, %8 : vector<8x96xf32>
    %10 = vector.extract_strided_slice %9 {offsets = [0, 0], sizes = [8, 32], strides = [1, 1]} : vector<8x96xf32> to vector<8x32xf32>
    %11 = vector.extract_strided_slice %9 {offsets = [0, 32], sizes = [8, 32], strides = [1, 1]} : vector<8x96xf32> to vector<8x32xf32>
    %12 = vector.extract_strided_slice %9 {offsets = [0, 64], sizes = [8, 32], strides = [1, 1]} : vector<8x96xf32> to vector<8x32xf32>
    %13 = tpu.iota {dimensions = array<i32: 1>} : vector<8x8xi32>
    %14 = vector.broadcast %1 : i32 to vector<8x8xi32>
    %15 = arith.cmpi slt, %13, %14 : vector<8x8xi32>
    %cst_6 = arith.constant 0.000000e+00 : f32
    %cst_7 = arith.constant -1.000000e+09 : f32
    %16 = vector.broadcast %cst_6 : f32 to vector<8x8xf32>
    %17 = vector.broadcast %cst_7 : f32 to vector<8x8xf32>
    %18 = arith.select %15, %16, %17 : vector<8x8xi1>, vector<8x8xf32>
    %19 = vector.extract_strided_slice %10 {offsets = [0, 0], sizes = [8, 8], strides = [1, 1]} : vector<8x32xf32> to vector<8x8xf32>
    %20 = arith.truncf %19 : vector<8x8xf32> to vector<8x8xbf16>
    %21 = vector.extract_strided_slice %11 {offsets = [0, 0], sizes = [8, 8], strides = [1, 1]} : vector<8x32xf32> to vector<8x8xf32>
    %22 = arith.truncf %21 : vector<8x8xf32> to vector<8x8xbf16>
    %23 = vector.extract_strided_slice %12 {offsets = [0, 0], sizes = [8, 8], strides = [1, 1]} : vector<8x32xf32> to vector<8x8xf32>
    %24 = arith.truncf %23 : vector<8x8xf32> to vector<8x8xbf16>
    %cst_8 = arith.constant dense<0.000000e+00> : vector<8x8xf32>
    %25 = tpu.matmul %20, %22, %cst_8 {dimension_numbers = #tpu.dot_dimension_numbers<[1], [1], [0], [0], [0, 0, 1, 0], [], []>} : vector<8x8xbf16>, vector<8x8xbf16>, vector<8x8xf32> -> vector<8x8xf32>
    %cst_9 = arith.constant 0.353553385 : f32
    %26 = vector.broadcast %cst_9 : f32 to vector<8x8xf32>
    %27 = arith.mulf %25, %26 : vector<8x8xf32>
    %28 = arith.addf %27, %18 : vector<8x8xf32>
    %cst_10 = arith.constant dense<0xFF800000> : vector<8xf32>
    %29 = vector.multi_reduction <maximumf>, %28, %cst_10 [1] : vector<8x8xf32> to vector<8xf32>
    %30 = vector.shape_cast %29 : vector<8xf32> to vector<8x1xf32>
    %31 = vector.broadcast %30 : vector<8x1xf32> to vector<8x8xf32>
    %32 = arith.subf %28, %31 : vector<8x8xf32>
    %33 = math.exp %32 : vector<8x8xf32>
    %cst_11 = arith.constant dense<0.000000e+00> : vector<8xf32>
    %34 = vector.multi_reduction <add>, %33, %cst_11 [1] : vector<8x8xf32> to vector<8xf32>
    %35 = vector.shape_cast %34 : vector<8xf32> to vector<8x1xf32>
    %36 = tpu.reciprocal %35 {approx = true} : vector<8x1xf32> -> vector<8x1xf32>
    %37 = vector.broadcast %36 : vector<8x1xf32> to vector<8x8xf32>
    %38 = arith.mulf %33, %37 : vector<8x8xf32>
    %39 = arith.truncf %38 : vector<8x8xf32> to vector<8x8xbf16>
    %cst_12 = arith.constant dense<0.000000e+00> : vector<8x8xf32>
    %40 = tpu.matmul %39, %24, %cst_12 {dimension_numbers = #tpu.dot_dimension_numbers<[1], [0], [0], [1], [0, 0, 1, 1], [], []>} : vector<8x8xbf16>, vector<8x8xbf16>, vector<8x8xf32> -> vector<8x8xf32>
    %41 = arith.truncf %40 : vector<8x8xf32> to vector<8x8xbf16>
    %c0_13 = arith.constant 0 : index
    %c0_14 = arith.constant 0 : index
    %42 = vector.load %arg16[%c0_13, %c0_14] : memref<8x32xbf16, #tpu.memory_space<vmem>>, vector<8x8xbf16>
    tpu.vector_store %arg16[%c0_13, %c0_14], %41 {strides = array<i32>} : memref<8x32xbf16, #tpu.memory_space<vmem>>, vector<8x8xbf16>,
    %43 = vector.extract_strided_slice %10 {offsets = [0, 8], sizes = [8, 8], strides = [1, 1]} : vector<8x32xf32> to vector<8x8xf32>
    %44 = arith.truncf %43 : vector<8x8xf32> to vector<8x8xbf16>
    %45 = vector.extract_strided_slice %11 {offsets = [0, 8], sizes = [8, 8], strides = [1, 1]} : vector<8x32xf32> to vector<8x8xf32>
    %46 = arith.truncf %45 : vector<8x8xf32> to vector<8x8xbf16>
    %47 = vector.extract_strided_slice %12 {offsets = [0, 8], sizes = [8, 8], strides = [1, 1]} : vector<8x32xf32> to vector<8x8xf32>
    %48 = arith.truncf %47 : vector<8x8xf32> to vector<8x8xbf16>
    %cst_15 = arith.constant dense<0.000000e+00> : vector<8x8xf32>
    %49 = tpu.matmul %44, %46, %cst_15 {dimension_numbers = #tpu.dot_dimension_numbers<[1], [1], [0], [0], [0, 0, 1, 0], [], []>} : vector<8x8xbf16>, vector<8x8xbf16>, vector<8x8xf32> -> vector<8x8xf32>
    %cst_16 = arith.constant 0.353553385 : f32
    %50 = vector.broadcast %cst_16 : f32 to vector<8x8xf32>
    %51 = arith.mulf %49, %50 : vector<8x8xf32>
    %52 = arith.addf %51, %18 : vector<8x8xf32>
    %cst_17 = arith.constant dense<0xFF800000> : vector<8xf32>
    %53 = vector.multi_reduction <maximumf>, %52, %cst_17 [1] : vector<8x8xf32> to vector<8xf32>
    %54 = vector.shape_cast %53 : vector<8xf32> to vector<8x1xf32>
    %55 = vector.broadcast %54 : vector<8x1xf32> to vector<8x8xf32>
    %56 = arith.subf %52, %55 : vector<8x8xf32>
    %57 = math.exp %56 : vector<8x8xf32>
    %cst_18 = arith.constant dense<0.000000e+00> : vector<8xf32>
    %58 = vector.multi_reduction <add>, %57, %cst_18 [1] : vector<8x8xf32> to vector<8xf32>
    %59 = vector.shape_cast %58 : vector<8xf32> to vector<8x1xf32>
    %60 = tpu.reciprocal %59 {approx = true} : vector<8x1xf32> -> vector<8x1xf32>
    %61 = vector.broadcast %60 : vector<8x1xf32> to vector<8x8xf32>
    %62 = arith.mulf %57, %61 : vector<8x8xf32>
    %63 = arith.truncf %62 : vector<8x8xf32> to vector<8x8xbf16>
    %cst_19 = arith.constant dense<0.000000e+00> : vector<8x8xf32>
    %64 = tpu.matmul %63, %48, %cst_19 {dimension_numbers = #tpu.dot_dimension_numbers<[1], [0], [0], [1], [0, 0, 1, 1], [], []>} : vector<8x8xbf16>, vector<8x8xbf16>, vector<8x8xf32> -> vector<8x8xf32>
    %65 = arith.truncf %64 : vector<8x8xf32> to vector<8x8xbf16>
    %c0_20 = arith.constant 0 : index
    %c8 = arith.constant 8 : index
    %66 = vector.load %arg16[%c0_20, %c8] : memref<8x32xbf16, #tpu.memory_space<vmem>>, vector<8x8xbf16>
    tpu.vector_store %arg16[%c0_20, %c8], %65 {strides = array<i32>} : memref<8x32xbf16, #tpu.memory_space<vmem>>, vector<8x8xbf16>,
    %67 = vector.extract_strided_slice %10 {offsets = [0, 16], sizes = [8, 8], strides = [1, 1]} : vector<8x32xf32> to vector<8x8xf32>
    %68 = arith.truncf %67 : vector<8x8xf32> to vector<8x8xbf16>
    %69 = vector.extract_strided_slice %11 {offsets = [0, 16], sizes = [8, 8], strides = [1, 1]} : vector<8x32xf32> to vector<8x8xf32>
    %70 = arith.truncf %69 : vector<8x8xf32> to vector<8x8xbf16>
    %71 = vector.extract_strided_slice %12 {offsets = [0, 16], sizes = [8, 8], strides = [1, 1]} : vector<8x32xf32> to vector<8x8xf32>
    %72 = arith.truncf %71 : vector<8x8xf32> to vector<8x8xbf16>
    %cst_21 = arith.constant dense<0.000000e+00> : vector<8x8xf32>
    %73 = tpu.matmul %68, %70, %cst_21 {dimension_numbers = #tpu.dot_dimension_numbers<[1], [1], [0], [0], [0, 0, 1, 0], [], []>} : vector<8x8xbf16>, vector<8x8xbf16>, vector<8x8xf32> -> vector<8x8xf32>
    %cst_22 = arith.constant 0.353553385 : f32
    %74 = vector.broadcast %cst_22 : f32 to vector<8x8xf32>
    %75 = arith.mulf %73, %74 : vector<8x8xf32>
    %76 = arith.addf %75, %18 : vector<8x8xf32>
    %cst_23 = arith.constant dense<0xFF800000> : vector<8xf32>
    %77 = vector.multi_reduction <maximumf>, %76, %cst_23 [1] : vector<8x8xf32> to vector<8xf32>
    %78 = vector.shape_cast %77 : vector<8xf32> to vector<8x1xf32>
    %79 = vector.broadcast %78 : vector<8x1xf32> to vector<8x8xf32>
    %80 = arith.subf %76, %79 : vector<8x8xf32>
    %81 = math.exp %80 : vector<8x8xf32>
    %cst_24 = arith.constant dense<0.000000e+00> : vector<8xf32>
    %82 = vector.multi_reduction <add>, %81, %cst_24 [1] : vector<8x8xf32> to vector<8xf32>
    %83 = vector.shape_cast %82 : vector<8xf32> to vector<8x1xf32>
    %84 = tpu.reciprocal %83 {approx = true} : vector<8x1xf32> -> vector<8x1xf32>
    %85 = vector.broadcast %84 : vector<8x1xf32> to vector<8x8xf32>
    %86 = arith.mulf %81, %85 : vector<8x8xf32>
    %87 = arith.truncf %86 : vector<8x8xf32> to vector<8x8xbf16>
    %cst_25 = arith.constant dense<0.000000e+00> : vector<8x8xf32>
    %88 = tpu.matmul %87, %72, %cst_25 {dimension_numbers = #tpu.dot_dimension_numbers<[1], [0], [0], [1], [0, 0, 1, 1], [], []>} : vector<8x8xbf16>, vector<8x8xbf16>, vector<8x8xf32> -> vector<8x8xf32>
    %89 = arith.truncf %88 : vector<8x8xf32> to vector<8x8xbf16>
    %c0_26 = arith.constant 0 : index
    %c16 = arith.constant 16 : index
    %90 = vector.load %arg16[%c0_26, %c16] : memref<8x32xbf16, #tpu.memory_space<vmem>>, vector<8x8xbf16>
    tpu.vector_store %arg16[%c0_26, %c16], %89 {strides = array<i32>} : memref<8x32xbf16, #tpu.memory_space<vmem>>, vector<8x8xbf16>,
    %91 = vector.extract_strided_slice %10 {offsets = [0, 24], sizes = [8, 8], strides = [1, 1]} : vector<8x32xf32> to vector<8x8xf32>
    %92 = arith.truncf %91 : vector<8x8xf32> to vector<8x8xbf16>
    %93 = vector.extract_strided_slice %11 {offsets = [0, 24], sizes = [8, 8], strides = [1, 1]} : vector<8x32xf32> to vector<8x8xf32>
    %94 = arith.truncf %93 : vector<8x8xf32> to vector<8x8xbf16>
    %95 = vector.extract_strided_slice %12 {offsets = [0, 24], sizes = [8, 8], strides = [1, 1]} : vector<8x32xf32> to vector<8x8xf32>
    %96 = arith.truncf %95 : vector<8x8xf32> to vector<8x8xbf16>
    %cst_27 = arith.constant dense<0.000000e+00> : vector<8x8xf32>
    %97 = tpu.matmul %92, %94, %cst_27 {dimension_numbers = #tpu.dot_dimension_numbers<[1], [1], [0], [0], [0, 0, 1, 0], [], []>} : vector<8x8xbf16>, vector<8x8xbf16>, vector<8x8xf32> -> vector<8x8xf32>
    %cst_28 = arith.constant 0.353553385 : f32
    %98 = vector.broadcast %cst_28 : f32 to vector<8x8xf32>
    %99 = arith.mulf %97, %98 : vector<8x8xf32>
    %100 = arith.addf %99, %18 : vector<8x8xf32>
    %cst_29 = arith.constant dense<0xFF800000> : vector<8xf32>
    %101 = vector.multi_reduction <maximumf>, %100, %cst_29 [1] : vector<8x8xf32> to vector<8xf32>
    %102 = vector.shape_cast %101 : vector<8xf32> to vector<8x1xf32>
    %103 = vector.broadcast %102 : vector<8x1xf32> to vector<8x8xf32>
    %104 = arith.subf %100, %103 : vector<8x8xf32>
    %105 = math.exp %104 : vector<8x8xf32>
    %cst_30 = arith.constant dense<0.000000e+00> : vector<8xf32>
    %106 = vector.multi_reduction <add>, %105, %cst_30 [1] : vector<8x8xf32> to vector<8xf32>
    %107 = vector.shape_cast %106 : vector<8xf32> to vector<8x1xf32>
    %108 = tpu.reciprocal %107 {approx = true} : vector<8x1xf32> -> vector<8x1xf32>
    %109 = vector.broadcast %108 : vector<8x1xf32> to vector<8x8xf32>
    %110 = arith.mulf %105, %109 : vector<8x8xf32>
    %111 = arith.truncf %110 : vector<8x8xf32> to vector<8x8xbf16>
    %cst_31 = arith.constant dense<0.000000e+00> : vector<8x8xf32>
    %112 = tpu.matmul %111, %96, %cst_31 {dimension_numbers = #tpu.dot_dimension_numbers<[1], [0], [0], [1], [0, 0, 1, 1], [], []>} : vector<8x8xbf16>, vector<8x8xbf16>, vector<8x8xf32> -> vector<8x8xf32>
    %113 = arith.truncf %112 : vector<8x8xf32> to vector<8x8xbf16>
    %c0_32 = arith.constant 0 : index
    %c24 = arith.constant 24 : index
    %114 = vector.load %arg16[%c0_32, %c24] : memref<8x32xbf16, #tpu.memory_space<vmem>>, vector<8x8xbf16>
    tpu.vector_store %arg16[%c0_32, %c24], %113 {strides = array<i32>} : memref<8x32xbf16, #tpu.memory_space<vmem>>, vector<8x8xbf16>,
    %c0_33 = arith.constant 0 : index
    %c0_34 = arith.constant 0 : index
    %115 = vector.load %arg16[%c0_33, %c0_34] : memref<8x32xbf16, #tpu.memory_space<vmem>>, vector<8x32xbf16>
    %c0_35 = arith.constant 0 : index
    %c0_36 = arith.constant 0 : index
    %116 = vector.load %arg5[%c0_35, %c0_36] : memref<32x32xbf16, #tpu.memory_space<vmem>>, vector<32x32xbf16>
    %cst_37 = arith.constant dense<0.000000e+00> : vector<8x32xf32>
    %117 = tpu.matmul %115, %116, %cst_37 {dimension_numbers = #tpu.dot_dimension_numbers<[1], [0], [0], [1], [0, 0, 1, 1], [], []>} : vector<8x32xbf16>, vector<32x32xbf16>, vector<8x32xf32> -> vector<8x32xf32>
    %c0_38 = arith.constant 0 : index
    %c0_39 = arith.constant 0 : index
    %118 = vector.load %arg6[%c0_38, %c0_39] : memref<1x32xf32, #tpu.memory_space<vmem>>, vector<1x32xf32>
    %119 = vector.broadcast %118 : vector<1x32xf32> to vector<8x32xf32>
    %120 = arith.addf %117, %119 : vector<8x32xf32>
    %121 = arith.addf %3, %120 : vector<8x32xf32>
    %c0_40 = arith.constant 0 : index
    %c0_41 = arith.constant 0 : index
    %122 = vector.load %arg7[%c0_40, %c0_41] : memref<1x32xf32, #tpu.memory_space<vmem>>, vector<1x32xf32>
    %c0_42 = arith.constant 0 : index
    %c0_43 = arith.constant 0 : index
    %123 = vector.load %arg8[%c0_42, %c0_43] : memref<1x32xf32, #tpu.memory_space<vmem>>, vector<1x32xf32>
    %cst_44 = arith.constant dense<0.000000e+00> : vector<8xf32>
    %124 = vector.multi_reduction <add>, %121, %cst_44 [1] : vector<8x32xf32> to vector<8xf32>
    %125 = vector.shape_cast %124 : vector<8xf32> to vector<8x1xf32>
    %cst_45 = arith.constant 3.200000e+01 : f32
    %126 = vector.broadcast %cst_45 : f32 to vector<8x1xf32>
    %127 = arith.divf %125, %126 : vector<8x1xf32>
    %128 = vector.broadcast %127 : vector<8x1xf32> to vector<8x32xf32>
    %129 = arith.subf %121, %128 : vector<8x32xf32>
    %130 = arith.mulf %129, %129 : vector<8x32xf32>
    %cst_46 = arith.constant dense<0.000000e+00> : vector<8xf32>
    %131 = vector.multi_reduction <add>, %130, %cst_46 [1] : vector<8x32xf32> to vector<8xf32>
    %132 = vector.shape_cast %131 : vector<8xf32> to vector<8x1xf32>
    %cst_47 = arith.constant 3.200000e+01 : f32
    %133 = vector.broadcast %cst_47 : f32 to vector<8x1xf32>
    %134 = arith.divf %132, %133 : vector<8x1xf32>
    %135 = vector.broadcast %127 : vector<8x1xf32> to vector<8x32xf32>
    %136 = arith.subf %121, %135 : vector<8x32xf32>
    %cst_48 = arith.constant 9.99999974E-6 : f32
    %137 = vector.broadcast %cst_48 : f32 to vector<8x1xf32>
    %138 = arith.addf %134, %137 : vector<8x1xf32>
    %139 = math.rsqrt %138 : vector<8x1xf32>
    %140 = vector.broadcast %139 : vector<8x1xf32> to vector<8x32xf32>
    %141 = arith.mulf %136, %140 : vector<8x32xf32>
    %142 = vector.broadcast %122 : vector<1x32xf32> to vector<8x32xf32>
    %143 = arith.mulf %141, %142 : vector<8x32xf32>
    %144 = vector.broadcast %123 : vector<1x32xf32> to vector<8x32xf32>
    %145 = arith.addf %143, %144 : vector<8x32xf32>
    %146 = arith.truncf %145 : vector<8x32xf32> to vector<8x32xbf16>
    %c0_49 = arith.constant 0 : index
    %c0_50 = arith.constant 0 : index
    %147 = vector.load %arg9[%c0_49, %c0_50] : memref<32x64xbf16, #tpu.memory_space<vmem>>, vector<32x64xbf16>
    %cst_51 = arith.constant dense<0.000000e+00> : vector<8x64xf32>
    %148 = tpu.matmul %146, %147, %cst_51 {dimension_numbers = #tpu.dot_dimension_numbers<[1], [0], [0], [1], [0, 0, 1, 1], [], []>} : vector<8x32xbf16>, vector<32x64xbf16>, vector<8x64xf32> -> vector<8x64xf32>
    %c0_52 = arith.constant 0 : index
    %c0_53 = arith.constant 0 : index
    %149 = vector.load %arg10[%c0_52, %c0_53] : memref<1x64xf32, #tpu.memory_space<vmem>>, vector<1x64xf32>
    %150 = vector.broadcast %149 : vector<1x64xf32> to vector<8x64xf32>
    %151 = arith.addf %148, %150 : vector<8x64xf32>
    %cst_54 = arith.constant 0.000000e+00 : f32
    %152 = vector.broadcast %cst_54 : f32 to vector<8x64xf32>
    %153 = arith.maximumf %151, %152 : vector<8x64xf32>
    %154 = arith.truncf %153 : vector<8x64xf32> to vector<8x64xbf16>
    %c0_55 = arith.constant 0 : index
    %c0_56 = arith.constant 0 : index
    %155 = vector.load %arg11[%c0_55, %c0_56] : memref<64x32xbf16, #tpu.memory_space<vmem>>, vector<64x32xbf16>
    %cst_57 = arith.constant dense<0.000000e+00> : vector<8x32xf32>
    %156 = tpu.matmul %154, %155, %cst_57 {dimension_numbers = #tpu.dot_dimension_numbers<[1], [0], [0], [1], [0, 0, 1, 1], [], []>} : vector<8x64xbf16>, vector<64x32xbf16>, vector<8x32xf32> -> vector<8x32xf32>
    %c0_58 = arith.constant 0 : index
    %c0_59 = arith.constant 0 : index
    %157 = vector.load %arg12[%c0_58, %c0_59] : memref<1x32xf32, #tpu.memory_space<vmem>>, vector<1x32xf32>
    %158 = vector.broadcast %157 : vector<1x32xf32> to vector<8x32xf32>
    %159 = arith.addf %156, %158 : vector<8x32xf32>
    %160 = arith.addf %145, %159 : vector<8x32xf32>
    %c0_60 = arith.constant 0 : index
    %c0_61 = arith.constant 0 : index
    %161 = vector.load %arg13[%c0_60, %c0_61] : memref<1x32xf32, #tpu.memory_space<vmem>>, vector<1x32xf32>
    %c0_62 = arith.constant 0 : index
    %c0_63 = arith.constant 0 : index
    %162 = vector.load %arg14[%c0_62, %c0_63] : memref<1x32xf32, #tpu.memory_space<vmem>>, vector<1x32xf32>
    %cst_64 = arith.constant dense<0.000000e+00> : vector<8xf32>
    %163 = vector.multi_reduction <add>, %160, %cst_64 [1] : vector<8x32xf32> to vector<8xf32>
    %164 = vector.shape_cast %163 : vector<8xf32> to vector<8x1xf32>
    %cst_65 = arith.constant 3.200000e+01 : f32
    %165 = vector.broadcast %cst_65 : f32 to vector<8x1xf32>
    %166 = arith.divf %164, %165 : vector<8x1xf32>
    %167 = vector.broadcast %166 : vector<8x1xf32> to vector<8x32xf32>
    %168 = arith.subf %160, %167 : vector<8x32xf32>
    %169 = arith.mulf %168, %168 : vector<8x32xf32>
    %cst_66 = arith.constant dense<0.000000e+00> : vector<8xf32>
    %170 = vector.multi_reduction <add>, %169, %cst_66 [1] : vector<8x32xf32> to vector<8xf32>
    %171 = vector.shape_cast %170 : vector<8xf32> to vector<8x1xf32>
    %cst_67 = arith.constant 3.200000e+01 : f32
    %172 = vector.broadcast %cst_67 : f32 to vector<8x1xf32>
    %173 = arith.divf %171, %172 : vector<8x1xf32>
    %174 = vector.broadcast %166 : vector<8x1xf32> to vector<8x32xf32>
    %175 = arith.subf %160, %174 : vector<8x32xf32>
    %cst_68 = arith.constant 9.99999974E-6 : f32
    %176 = vector.broadcast %cst_68 : f32 to vector<8x1xf32>
    %177 = arith.addf %173, %176 : vector<8x1xf32>
    %178 = math.rsqrt %177 : vector<8x1xf32>
    %179 = vector.broadcast %178 : vector<8x1xf32> to vector<8x32xf32>
    %180 = arith.mulf %175, %179 : vector<8x32xf32>
    %181 = vector.broadcast %161 : vector<1x32xf32> to vector<8x32xf32>
    %182 = arith.mulf %180, %181 : vector<8x32xf32>
    %183 = vector.broadcast %162 : vector<1x32xf32> to vector<8x32xf32>
    %184 = arith.addf %182, %183 : vector<8x32xf32>
    %185 = arith.truncf %184 : vector<8x32xf32> to vector<8x32xbf16>
    %c0_69 = arith.constant 0 : index
    %c0_70 = arith.constant 0 : index
    %c0_71 = arith.constant 0 : index
    %186 = vector.load %arg15[%c0_69, %c0_70, %c0_71] : memref<1x8x32xbf16, #tpu.memory_space<vmem>>, vector<1x8x32xbf16>
    %187 = vector.shape_cast %186 : vector<1x8x32xbf16> to vector<8x32xbf16>
    %188 = vector.shape_cast %185 : vector<8x32xbf16> to vector<1x8x32xbf16>
    tpu.vector_store %arg15[%c0_69, %c0_70, %c0_71], %188 {strides = array<i32>} : memref<1x8x32xbf16, #tpu.memory_space<vmem>>, vector<1x8x32xbf16>,
    return
  }
  func.func @transform_0(%arg0: i32, %arg1: memref<2xi32, #tpu.memory_space<smem>>) -> (i32, i32, i32) {
    %c0_i32 = arith.constant 0 : i32
    %c0_i32_0 = arith.constant 0 : i32
    %c0_i32_1 = arith.constant 0 : i32
    return %arg0, %c0_i32, %c0_i32_0 : i32, i32, i32
  }
  func.func @transform_1(%arg0: i32, %arg1: memref<2xi32, #tpu.memory_space<smem>>) -> (i32, i32) {
    %c0_i32 = arith.constant 0 : i32
    %c0_i32_0 = arith.constant 0 : i32
    %c0_i32_1 = arith.constant 0 : i32
    return %c0_i32, %c0_i32_0 : i32, i32
  }
  func.func @transform_2(%arg0: i32, %arg1: memref<2xi32, #tpu.memory_space<smem>>) -> (i32, i32) {
    %c0_i32 = arith.constant 0 : i32
    %c0_i32_0 = arith.constant 0 : i32
    %c0_i32_1 = arith.constant 0 : i32
    return %c0_i32, %c0_i32_0 : i32, i32
  }
  func.func @transform_3(%arg0: i32, %arg1: memref<2xi32, #tpu.memory_space<smem>>) -> (i32, i32) {
    %c0_i32 = arith.constant 0 : i32
    %c0_i32_0 = arith.constant 0 : i32
    %c0_i32_1 = arith.constant 0 : i32
    return %c0_i32, %c0_i32_0 : i32, i32
  }
  func.func @transform_4(%arg0: i32, %arg1: memref<2xi32, #tpu.memory_space<smem>>) -> (i32, i32) {
    %c0_i32 = arith.constant 0 : i32
    %c0_i32_0 = arith.constant 0 : i32
    %c0_i32_1 = arith.constant 0 : i32
    return %c0_i32, %c0_i32_0 : i32, i32
  }
  func.func @transform_5(%arg0: i32, %arg1: memref<2xi32, #tpu.memory_space<smem>>) -> (i32, i32) {
    %c0_i32 = arith.constant 0 : i32
    %c0_i32_0 = arith.constant 0 : i32
    %c0_i32_1 = arith.constant 0 : i32
    return %c0_i32, %c0_i32_0 : i32, i32
  }
  func.func @transform_6(%arg0: i32, %arg1: memref<2xi32, #tpu.memory_space<smem>>) -> (i32, i32) {
    %c0_i32 = arith.constant 0 : i32
    %c0_i32_0 = arith.constant 0 : i32
    %c0_i32_1 = arith.constant 0 : i32
    return %c0_i32, %c0_i32_0 : i32, i32
  }
  func.func @transform_7(%arg0: i32, %arg1: memref<2xi32, #tpu.memory_space<smem>>) -> (i32, i32) {
    %c0_i32 = arith.constant 0 : i32
    %c0_i32_0 = arith.constant 0 : i32
    %c0_i32_1 = arith.constant 0 : i32
    return %c0_i32, %c0_i32_0 : i32, i32
  }
  func.func @transform_8(%arg0: i32, %arg1: memref<2xi32, #tpu.memory_space<smem>>) -> (i32, i32) {
    %c0_i32 = arith.constant 0 : i32
    %c0_i32_0 = arith.constant 0 : i32
    %c0_i32_1 = arith.constant 0 : i32
    return %c0_i32, %c0_i32_0 : i32, i32
  }
  func.func @transform_9(%arg0: i32, %arg1: memref<2xi32, #tpu.memory_space<smem>>) -> (i32, i32) {
    %c0_i32 = arith.constant 0 : i32
    %c0_i32_0 = arith.constant 0 : i32
    %c0_i32_1 = arith.constant 0 : i32
    return %c0_i32, %c0_i32_0 : i32, i32
  }
  func.func @transform_10(%arg0: i32, %arg1: memref<2xi32, #tpu.memory_space<smem>>) -> (i32, i32) {
    %c0_i32 = arith.constant 0 : i32
    %c0_i32_0 = arith.constant 0 : i32
    %c0_i32_1 = arith.constant 0 : i32
    return %c0_i32, %c0_i32_0 : i32, i32
  }
  func.func @transform_11(%arg0: i32, %arg1: memref<2xi32, #tpu.memory_space<smem>>) -> (i32, i32) {
    %c0_i32 = arith.constant 0 : i32
    %c0_i32_0 = arith.constant 0 : i32
    %c0_i32_1 = arith.constant 0 : i32
    return %c0_i32, %c0_i32_0 : i32, i32
  }
  func.func @transform_12(%arg0: i32, %arg1: memref<2xi32, #tpu.memory_space<smem>>) -> (i32, i32) {
    %c0_i32 = arith.constant 0 : i32
    %c0_i32_0 = arith.constant 0 : i32
    %c0_i32_1 = arith.constant 0 : i32
    return %c0_i32, %c0_i32_0 : i32, i32
  }
  func.func @transform_13(%arg0: i32, %arg1: memref<2xi32, #tpu.memory_space<smem>>) -> (i32, i32, i32) {
    %c0_i32 = arith.constant 0 : i32
    %c0_i32_0 = arith.constant 0 : i32
    %c0_i32_1 = arith.constant 0 : i32
    return %arg0, %c0_i32, %c0_i32_0 : i32, i32, i32
  }
}

module attributes {stable_mosaic.version = 11 : i64} {
  func.func @_latent_kernel(%arg0: i32, %arg1: memref<2x32xbf16, #tpu.memory_space<vmem>>, %arg2: memref<32x32xbf16, #tpu.memory_space<vmem>>, %arg3: memref<1x32xf32, #tpu.memory_space<vmem>>, %arg4: memref<2x16xf32, #tpu.memory_space<vmem>>, %arg5: memref<16x32xbf16, #tpu.memory_space<vmem>>, %arg6: memref<1x32xf32, #tpu.memory_space<vmem>>, %arg7: memref<2x16xf32, #tpu.memory_space<vmem>>, %arg8: memref<2x16xf32, #tpu.memory_space<vmem>>, %arg9: memref<2x32xf32, #tpu.memory_space<vmem>>) attributes {dimension_semantics = [#tpu.dimension_semantics<arbitrary>], iteration_bounds = array<i64: 1>, scalar_prefetch = 0 : i64, scratch_operands = 0 : i64, tpu.core_type = #tpu.core_type<tc>, window_params = [{pipeline_mode = #tpu.pipeline_mode<synchronous>, transform_indices = @transform_0, window_bounds = array<i64: 2, 32>}, {pipeline_mode = #tpu.pipeline_mode<synchronous>, transform_indices = @transform_1, window_bounds = array<i64: 32, 32>}, {pipeline_mode = #tpu.pipeline_mode<synchronous>, transform_indices = @transform_2, window_bounds = array<i64: 1, 32>}, {pipeline_mode = #tpu.pipeline_mode<synchronous>, transform_indices = @transform_3, window_bounds = array<i64: 2, 16>}, {pipeline_mode = #tpu.pipeline_mode<synchronous>, transform_indices = @transform_4, window_bounds = array<i64: 16, 32>}, {pipeline_mode = #tpu.pipeline_mode<synchronous>, transform_indices = @transform_5, window_bounds = array<i64: 1, 32>}, {pipeline_mode = #tpu.pipeline_mode<synchronous>, transform_indices = @transform_6, window_bounds = array<i64: 2, 16>}, {pipeline_mode = #tpu.pipeline_mode<synchronous>, transform_indices = @transform_7, window_bounds = array<i64: 2, 16>}, {pipeline_mode = #tpu.pipeline_mode<synchronous>, transform_indices = @transform_8, window_bounds = array<i64: 2, 32>}]} {
    %c0 = arith.constant 0 : index
    %c0_0 = arith.constant 0 : index
    %0 = vector.load %arg1[%c0, %c0_0] : memref<2x32xbf16, #tpu.memory_space<vmem>>, vector<2x32xbf16>
    %c0_1 = arith.constant 0 : index
    %c0_2 = arith.constant 0 : index
    %1 = vector.load %arg2[%c0_1, %c0_2] : memref<32x32xbf16, #tpu.memory_space<vmem>>, vector<32x32xbf16>
    %cst = arith.constant dense<0.000000e+00> : vector<2x32xf32>
    %2 = tpu.matmul %0, %1, %cst {dimension_numbers = #tpu.dot_dimension_numbers<[1], [0], [0], [1], [0, 0, 1, 1], [], []>} : vector<2x32xbf16>, vector<32x32xbf16>, vector<2x32xf32> -> vector<2x32xf32>
    %c0_3 = arith.constant 0 : index
    %c0_4 = arith.constant 0 : index
    %3 = vector.load %arg3[%c0_3, %c0_4] : memref<1x32xf32, #tpu.memory_space<vmem>>, vector<1x32xf32>
    %4 = vector.broadcast %3 : vector<1x32xf32> to vector<2x32xf32>
    %5 = arith.addf %2, %4 : vector<2x32xf32>
    %6 = vector.extract_strided_slice %5 {offsets = [0, 0], sizes = [2, 16], strides = [1, 1]} : vector<2x32xf32> to vector<2x16xf32>
    %7 = vector.extract_strided_slice %5 {offsets = [0, 16], sizes = [2, 16], strides = [1, 1]} : vector<2x32xf32> to vector<2x16xf32>
    %c0_5 = arith.constant 0 : index
    %c0_6 = arith.constant 0 : index
    %8 = vector.load %arg4[%c0_5, %c0_6] : memref<2x16xf32, #tpu.memory_space<vmem>>, vector<2x16xf32>
    %cst_7 = arith.constant 5.000000e-01 : f32
    %9 = vector.broadcast %cst_7 : f32 to vector<2x16xf32>
    %10 = arith.mulf %9, %7 : vector<2x16xf32>
    %11 = math.exp %10 : vector<2x16xf32>
    %12 = arith.mulf %8, %11 : vector<2x16xf32>
    %13 = arith.addf %6, %12 : vector<2x16xf32>
    %14 = arith.truncf %13 : vector<2x16xf32> to vector<2x16xbf16>
    %c0_8 = arith.constant 0 : index
    %c0_9 = arith.constant 0 : index
    %15 = vector.load %arg5[%c0_8, %c0_9] : memref<16x32xbf16, #tpu.memory_space<vmem>>, vector<16x32xbf16>
    %cst_10 = arith.constant dense<0.000000e+00> : vector<2x32xf32>
    %16 = tpu.matmul %14, %15, %cst_10 {dimension_numbers = #tpu.dot_dimension_numbers<[1], [0], [0], [1], [0, 0, 1, 1], [], []>} : vector<2x16xbf16>, vector<16x32xbf16>, vector<2x32xf32> -> vector<2x32xf32>
    %c0_11 = arith.constant 0 : index
    %c0_12 = arith.constant 0 : index
    %17 = vector.load %arg6[%c0_11, %c0_12] : memref<1x32xf32, #tpu.memory_space<vmem>>, vector<1x32xf32>
    %18 = vector.broadcast %17 : vector<1x32xf32> to vector<2x32xf32>
    %19 = arith.addf %16, %18 : vector<2x32xf32>
    %c0_13 = arith.constant 0 : index
    %c0_14 = arith.constant 0 : index
    %20 = vector.load %arg9[%c0_13, %c0_14] : memref<2x32xf32, #tpu.memory_space<vmem>>, vector<2x32xf32>
    tpu.vector_store %arg9[%c0_13, %c0_14], %19 {strides = array<i32>} : memref<2x32xf32, #tpu.memory_space<vmem>>, vector<2x32xf32>,
    %c0_15 = arith.constant 0 : index
    %c0_16 = arith.constant 0 : index
    %21 = vector.load %arg7[%c0_15, %c0_16] : memref<2x16xf32, #tpu.memory_space<vmem>>, vector<2x16xf32>
    tpu.vector_store %arg7[%c0_15, %c0_16], %6 {strides = array<i32>} : memref<2x16xf32, #tpu.memory_space<vmem>>, vector<2x16xf32>,
    %c0_17 = arith.constant 0 : index
    %c0_18 = arith.constant 0 : index
    %22 = vector.load %arg8[%c0_17, %c0_18] : memref<2x16xf32, #tpu.memory_space<vmem>>, vector<2x16xf32>
    tpu.vector_store %arg8[%c0_17, %c0_18], %7 {strides = array<i32>} : memref<2x16xf32, #tpu.memory_space<vmem>>, vector<2x16xf32>,
    return
  }
  func.func @transform_0(%arg0: i32) -> (i32, i32) {
    %c0_i32 = arith.constant 0 : i32
    %c0_i32_0 = arith.constant 0 : i32
    %c0_i32_1 = arith.constant 0 : i32
    return %c0_i32, %c0_i32_0 : i32, i32
  }
  func.func @transform_1(%arg0: i32) -> (i32, i32) {
    %c0_i32 = arith.constant 0 : i32
    %c0_i32_0 = arith.constant 0 : i32
    %c0_i32_1 = arith.constant 0 : i32
    return %c0_i32, %c0_i32_0 : i32, i32
  }
  func.func @transform_2(%arg0: i32) -> (i32, i32) {
    %c0_i32 = arith.constant 0 : i32
    %c0_i32_0 = arith.constant 0 : i32
    %c0_i32_1 = arith.constant 0 : i32
    return %c0_i32, %c0_i32_0 : i32, i32
  }
  func.func @transform_3(%arg0: i32) -> (i32, i32) {
    %c0_i32 = arith.constant 0 : i32
    %c0_i32_0 = arith.constant 0 : i32
    %c0_i32_1 = arith.constant 0 : i32
    return %c0_i32, %c0_i32_0 : i32, i32
  }
  func.func @transform_4(%arg0: i32) -> (i32, i32) {
    %c0_i32 = arith.constant 0 : i32
    %c0_i32_0 = arith.constant 0 : i32
    %c0_i32_1 = arith.constant 0 : i32
    return %c0_i32, %c0_i32_0 : i32, i32
  }
  func.func @transform_5(%arg0: i32) -> (i32, i32) {
    %c0_i32 = arith.constant 0 : i32
    %c0_i32_0 = arith.constant 0 : i32
    %c0_i32_1 = arith.constant 0 : i32
    return %c0_i32, %c0_i32_0 : i32, i32
  }
  func.func @transform_6(%arg0: i32) -> (i32, i32) {
    %c0_i32 = arith.constant 0 : i32
    %c0_i32_0 = arith.constant 0 : i32
    %c0_i32_1 = arith.constant 0 : i32
    return %c0_i32, %c0_i32_0 : i32, i32
  }
  func.func @transform_7(%arg0: i32) -> (i32, i32) {
    %c0_i32 = arith.constant 0 : i32
    %c0_i32_0 = arith.constant 0 : i32
    %c0_i32_1 = arith.constant 0 : i32
    return %c0_i32, %c0_i32_0 : i32, i32
  }
  func.func @transform_8(%arg0: i32) -> (i32, i32) {
    %c0_i32 = arith.constant 0 : i32
    %c0_i32_0 = arith.constant 0 : i32
    %c0_i32_1 = arith.constant 0 : i32
    return %c0_i32, %c0_i32_0 : i32, i32
  }
}

module attributes {stable_mosaic.version = 11 : i64} {
  func.func @_matmul_kernel(%arg0: i32, %arg1: i32, %arg2: i32, %arg3: memref<16x32xbf16, #tpu.memory_space<vmem>>, %arg4: memref<32x128xbf16, #tpu.memory_space<vmem>>, %arg5: memref<1x128xf32, #tpu.memory_space<vmem>>, %arg6: memref<16x128xf32, #tpu.memory_space<vmem>>, %arg7: memref<16x128xf32, #tpu.memory_space<vmem>>) attributes {dimension_semantics = [#tpu.dimension_semantics<parallel>, #tpu.dimension_semantics<parallel>, #tpu.dimension_semantics<arbitrary>], iteration_bounds = array<i64: 1, 1, 1>, scalar_prefetch = 0 : i64, scratch_operands = 1 : i64, tpu.core_type = #tpu.core_type<tc>, window_params = [{transform_indices = @transform_0, window_bounds = array<i64: 16, 32>}, {transform_indices = @transform_1, window_bounds = array<i64: 32, 128>}, {transform_indices = @transform_2, window_bounds = array<i64: 1, 128>}, {transform_indices = @transform_3, window_bounds = array<i64: 16, 128>}]} {
    %c0_i32 = arith.constant 0 : i32
    %0 = arith.cmpi eq, %arg2, %c0_i32 : i32
    %1 = arith.extui %0 : i1 to i32
    %c0_i32_0 = arith.constant 0 : i32
    %2 = arith.cmpi ne, %1, %c0_i32_0 : i32
    scf.if %2 {
      %cst_10 = arith.constant 0.000000e+00 : f32
      %12 = vector.broadcast %cst_10 : f32 to vector<16x128xf32>
      %c0_11 = arith.constant 0 : index
      %c0_12 = arith.constant 0 : index
      %13 = vector.load %arg7[%c0_11, %c0_12] : memref<16x128xf32, #tpu.memory_space<vmem>>, vector<16x128xf32>
      tpu.vector_store %arg7[%c0_11, %c0_12], %12 {strides = array<i32>} : memref<16x128xf32, #tpu.memory_space<vmem>>, vector<16x128xf32>,
    } else {
    }
    %c0 = arith.constant 0 : index
    %c0_1 = arith.constant 0 : index
    %3 = vector.load %arg7[%c0, %c0_1] : memref<16x128xf32, #tpu.memory_space<vmem>>, vector<16x128xf32>
    %c0_2 = arith.constant 0 : index
    %c0_3 = arith.constant 0 : index
    %4 = vector.load %arg3[%c0_2, %c0_3] : memref<16x32xbf16, #tpu.memory_space<vmem>>, vector<16x32xbf16>
    %c0_4 = arith.constant 0 : index
    %c0_5 = arith.constant 0 : index
    %5 = vector.load %arg4[%c0_4, %c0_5] : memref<32x128xbf16, #tpu.memory_space<vmem>>, vector<32x128xbf16>
    %cst = arith.constant dense<0.000000e+00> : vector<16x128xf32>
    %6 = tpu.matmul %4, %5, %cst {dimension_numbers = #tpu.dot_dimension_numbers<[1], [0], [0], [1], [0, 0, 1, 1], [], []>} : vector<16x32xbf16>, vector<32x128xbf16>, vector<16x128xf32> -> vector<16x128xf32>
    %7 = arith.addf %3, %6 : vector<16x128xf32>
    %c0_6 = arith.constant 0 : index
    %c0_7 = arith.constant 0 : index
    %8 = vector.load %arg7[%c0_6, %c0_7] : memref<16x128xf32, #tpu.memory_space<vmem>>, vector<16x128xf32>
    tpu.vector_store %arg7[%c0_6, %c0_7], %7 {strides = array<i32>} : memref<16x128xf32, #tpu.memory_space<vmem>>, vector<16x128xf32>,
    %c0_i32_8 = arith.constant 0 : i32
    %9 = arith.cmpi eq, %arg2, %c0_i32_8 : i32
    %10 = arith.extui %9 : i1 to i32
    %c0_i32_9 = arith.constant 0 : i32
    %11 = arith.cmpi ne, %10, %c0_i32_9 : i32
    scf.if %11 {
      %c0_10 = arith.constant 0 : index
      %c0_11 = arith.constant 0 : index
      %12 = vector.load %arg7[%c0_10, %c0_11] : memref<16x128xf32, #tpu.memory_space<vmem>>, vector<16x128xf32>
      %c0_12 = arith.constant 0 : index
      %c0_13 = arith.constant 0 : index
      %13 = vector.load %arg5[%c0_12, %c0_13] : memref<1x128xf32, #tpu.memory_space<vmem>>, vector<1x128xf32>
      %14 = vector.broadcast %13 : vector<1x128xf32> to vector<16x128xf32>
      %15 = arith.addf %12, %14 : vector<16x128xf32>
      %c0_14 = arith.constant 0 : index
      %c0_15 = arith.constant 0 : index
      %16 = vector.load %arg6[%c0_14, %c0_15] : memref<16x128xf32, #tpu.memory_space<vmem>>, vector<16x128xf32>
      tpu.vector_store %arg6[%c0_14, %c0_15], %15 {strides = array<i32>} : memref<16x128xf32, #tpu.memory_space<vmem>>, vector<16x128xf32>,
    } else {
    }
    return
  }
  func.func @transform_0(%arg0: i32, %arg1: i32, %arg2: i32) -> (i32, i32) {
    %c0_i32 = arith.constant 0 : i32
    return %arg0, %arg2 : i32, i32
  }
  func.func @transform_1(%arg0: i32, %arg1: i32, %arg2: i32) -> (i32, i32) {
    %c0_i32 = arith.constant 0 : i32
    return %arg2, %arg1 : i32, i32
  }
  func.func @transform_2(%arg0: i32, %arg1: i32, %arg2: i32) -> (i32, i32) {
    %c0_i32 = arith.constant 0 : i32
    %c0_i32_0 = arith.constant 0 : i32
    return %c0_i32, %arg1 : i32, i32
  }
  func.func @transform_3(%arg0: i32, %arg1: i32, %arg2: i32) -> (i32, i32) {
    %c0_i32 = arith.constant 0 : i32
    return %arg0, %arg1 : i32, i32
  }
}

</mosaic_0001>

<bundles_post_ra>
// kernel: vae_transformer_forward.5
= control target key start
LH: loop header
LB: loop body
LE: loop exit
PB: predicated region body
PF: predicated region fallthrough
CT: control target
= control target key end

     0   :  { %14 = vsyncpa [#allocation3], 0  ;;  %v288_v1 = vmov 0.0   ;;  %vm289_vm0 = vmmov 0   ;;  %s370_s0 = inlined_call_operand.vmem [shape: bf16[2,32], index: 0, kind: input, shape index: {}]   ;;  %s371_s1 = inlined_call_operand.vmem [shape: bf16[32,32], index: 1, kind: input, shape index: {}]   ;;  %s372_s2 = inlined_call_operand.vmem [shape: f32[1,32], index: 2, kind: input, shape index: {}]   ;;  %s373_s3 = inlined_call_operand.vmem [shape: f32[2,16], index: 3, kind: input, shape index: {}]   ;;  %s374_s4 = inlined_call_operand.vmem [shape: bf16[16,32], index: 4, kind: input, shape index: {}]   ;;  %s375_s5 = inlined_call_operand.vmem [shape: f32[1,32], index: 5, kind: input, shape index: {}]   ;;  %s376_s6 = inlined_call_operand.hbm [shape: f32[2,16], index: 6, kind: output, shape index: {0}]   ;;  %s377_s7 = inlined_call_operand.hbm [shape: f32[2,16], index: 7, kind: output, shape index: {1}]   ;;  %s378_s8 = inlined_call_operand.vmem [shape: f32[2,32], index: 8, kind: output, shape index: {2}]  }
   0x1   :  { %v239_v0 = vld [vmem:[%s371_s1 + $0x8] sm:$0xff]   ;;  %220 = vmatprep.subr.bf16.mxu0 %v288_v1  ;;  %228 = vmatprep.subr.bf16.mxu1 %v288_v1  ;;  %v240_v2 = vld [vmem:[%s371_s1] sm:$0xff]  }
   0x2   :  { %221 = vmatpush3.bf16.msra.mxu0 %v239_v0  ;;  %224 = vmatprep.mubr.msk.bf16.mxu0 %vm289_vm0, %v288_v1 }
   0x3   :  { %222 = vmatprep.subr.bf16.mxu0 %v288_v1  ;;  %230 = vmatprep.mubr.msk.bf16.mxu1 %vm289_vm0, %v288_v1 }
   0x4   :  { %15 = vsyncpa [#allocation5], 0  ;;  %v29_v3 = vld [vmem:[%s370_s0] sm:$0x1]  ;;  %vm53_vm1 = vcmask 261120   ;;  %vm169_vm2 = vcmask 123904  }
   0x5   :  { %v208_v4 = vld [vmem:[%s372_s2] ss:$0 sm:$0xff]  ;;  %s290_s0 = smov 112   ;;  %vm123_vm3 = vcmask 130048   ;;  %s291_s15 = smov [#allocation2]  }
   0x6   :  { %223 = vmatpush3.bf16.msra.mxu0 %v240_v2  ;;  %v241_v12 = vld [vmem:[%s374_s4] sm:$0xff]   ;;  %s182_s4 = sshll.u32 %s291_s15, 4  ;;  %s292_s16 = smov [#allocation4]   ;;  %s183_s4 = int_to_ptr.vmem [resolvable:$true] %s182_s4 }
   0x7   :  { %229 = vmatpush3.bf16.msra.mxu1 %v241_v12  ;;  %v97_v14 = vld [vmem:[%s373_s3] sm:$0x3]  ;;  %s192_s17 = sshll.u32 %s292_s16, 4  ;;  %s244_s18 = scalar_lea.vmem %s183_s4, 32  ;;  %s193_s17 = int_to_ptr.vmem [resolvable:$true] %s192_s17 }
   0x8   :  { %p245_p0 = scmp.ne.s32.totalorder %s183_s4, %s244_s18  ;;  %p249_p1 = scmp.lt.s32.totalorder %s183_s4, %s183_s4 }
   0x9   :  { %225 = vmatmul.mubr.msk.bf16.vlgmr.msra.gmra.mxu0 %vm53_vm1, %v29_v3  ;;  %p250_p2 = scmp.lt.s32.totalorder %s244_s18, %s244_s18 }
   0xb   :  { %p251_p3 = por %p250_p2, %p249_p1 }
   0xd   :  { %p252_p4 = pnand %p251_p3, %p245_p0 }
  0xc9   :  { %v91_v5 = vpop.f32.mrf.mxu0 }
  0xca   :  { %v92_v6 = vadd.f32 %v208_v4, %v91_v5 }
  0xcb   :  { %v226_v7 = vpop.f32.mrf.mxu0 }
  0xcc   :  { %v98_v8 = vmul.f32 0.5, %v92_v6  ;;  %170 = vst.msk [vmem:[#allocation2] sm:$0x3] %vm169_vm2, %v92_v6 }
  0xcd   :  { %v94_v9 = vpop.f32.mrf.mxu0 }
  0xce   :  { %v99_v10 = vmul.f32 1.442695, %v98_v8 }
  0xcf   :  { %v227_v11 = vpop.f32.mrf.mxu0 }
  0xd0   :  { %242 = vpow2.f32 %v99_v10 }
  0xdd   :  { %v243_v13 = vpop.eup %242 }
  0xde   :  { %102 = vrot.lane.b32.xlu0 %v243_v13, %s290_s0 }
  0xe2   :  { %172 = vrot.lane.b32.xlu0 %v92_v6, %s290_s0 }
 0x150   :  { %v103_v15 = vpop.permute.xlu0 %102 }
 0x151   :  { %v105_v16 = vmul.f32 %v103_v15, %v97_v14 }
 0x153   :  { %v106_v17 = vadd.f32 %v105_v16, %v92_v6 }
 0x154   :  { %v173_v18 = vpop.permute.xlu0 %172 }
 0x155   :  { %v107_v19 = vpack.c.bf16 %v106_v17, %v106_v17  ;;  %175 = vst.msk [vmem:[#allocation4] sm:$0x3] %vm169_vm2, %v173_v18 }
 0x157   :  { %231 = vmatmul.mubr.msk.bf16.vlgmr.msra.gmra.mxu1 %vm123_vm3, %v107_v19 }
 0x158   :  { %255 = shalt.err (!%p252_p4)
}
 0x159   :  { %185 = dma.vmem_to_hbm [thread:$0]  %s183_s4, 32, %s376_s6, [#allocation3]  }
 0x15a   :  { %s264_s20 = scalar_lea.vmem %s193_s17, 32  ;;  %p269_p6 = scmp.lt.s32.totalorder %s193_s17, %s193_s17 }
 0x15b   :  { %p265_p5 = scmp.ne.s32.totalorder %s193_s17, %s264_s20  ;;  %p270_p7 = scmp.lt.s32.totalorder %s264_s20, %s264_s20 }
 0x15d   :  { %p271_p8 = por %p270_p7, %p269_p6 }
 0x15f   :  { %p272_p9 = pnand %p271_p8, %p265_p5 }
 0x161   :  { %275 = shalt.err (!%p272_p9)
}
 0x162   :  { %195 = dma.vmem_to_hbm [thread:$0]  %s193_s17, 32, %s377_s7, [#allocation5]   ;;  %v212_v20 = vld [vmem:[%s375_s5] ss:$0 sm:$0xff]  ;;  %vm167_vm4 = vcmask 254976  }
 0x217   :  { %v161_v21 = vpop.f32.mrf.mxu1 }
 0x218   :  { %v162_v22 = vadd.f32 %v212_v20, %v161_v21 }
 0x219   :  { %v232_v23 = vpop.f32.mrf.mxu1 }
 0x21a   :  { %168 = vst.msk [vmem:[%s378_s8] sm:$0x3] %vm167_vm4, %v162_v22 }
 0x21b   :  { %v164_v24 = vpop.f32.mrf.mxu1 }
 0x21d   :  { %v233_v25 = vpop.f32.mrf.mxu1 }
 0x21e   :  { %284 = dma.done.wait [#allocation3], 32  }
 0x21f   :  { %285 = vsyncadd [#allocation3], 4294967264 }
 0x220   :  { %286 = dma.done.wait [#allocation5], 32  }
 0x221   :  { %287 = vsyncadd [#allocation5], 4294967264 }
 0x222   :  { %206 = vsyncpa [#allocation3], 1 }
 0x223   :  { %207 = vsyncpa [#allocation5], 1 }

// kernel: vae_transformer_forward.7
= control target key start
LH: loop header
LB: loop body
LE: loop exit
PB: predicated region body
PF: predicated region fallthrough
CT: control target
= control target key end

     0   :  { %v136_v0 = vmov 0.0   ;;  %vm137_vm0 = vmmov 0   ;;  %vm46_vm1 = vcmask 261120   ;;  %s176_s1 = inlined_call_operand.vmem [shape: bf16[32,128], index: 1, kind: input, shape index: {}]   ;;  %s177_s0 = inlined_call_operand.vmem [shape: bf16[16,32], index: 0, kind: input, shape index: {}]   ;;  %s178_s2 = inlined_call_operand.vmem [shape: f32[1,128], index: 2, kind: input, shape index: {}]   ;;  %s179_s3 = inlined_call_operand.vmem [shape: f32[16,128], index: 3, kind: output, shape index: {}]  }
   0x1   :  { %123 = vmatprep.subr.bf16.mxu0 %v136_v0  ;;  %v133_v1 = vld [vmem:[%s176_s1 + $0x8] sm:$0xff]   ;;  %127 = vmatprep.mubr.msk.bf16.mxu0 %vm137_vm0, %v136_v0  ;;  %v134_v2 = vld [vmem:[%s176_s1] sm:$0xff]  }
   0x2   :  { %124 = vmatpush3.bf16.msra.mxu0 %v133_v1  ;;  %v135_v3 = vld [vmem:[%s177_s0] sm:$0xff]  }
   0x3   :  { %125 = vmatprep.subr.bf16.mxu0 %v136_v0  ;;  %v119_v4 = vld [vmem:[%s178_s2] ss:$0 sm:$0xff] }
   0x6   :  { %126 = vmatpush3.bf16.msra.mxu0 %v134_v2 }
   0x9   :  { %128 = vmatmul.mubr.msk.bf16.vlgmr.msra.gmra.mxu0 %vm46_vm1, %v135_v3 }
  0xc9   :  { %v84_v5 = vpop.f32.mrf.mxu0 }
  0xca   :  { %v107_v6 = vadd.f32 %v119_v4, %v84_v5 }
  0xcb   :  { %v129_v7 = vpop.f32.mrf.mxu0 }
  0xcc   :  { %109 = vst [vmem:[%s179_s3] sm:$0xff] %v107_v6 }
  0xcd   :  { %v87_v8 = vpop.f32.mrf.mxu0 }
  0xce   :  { %v108_v9 = vadd.f32 %v119_v4, %v87_v8 }
  0xcf   :  { %v130_v10 = vpop.f32.mrf.mxu0 }
  0xd0   :  { %110 = vst [vmem:[%s179_s3 + $0x8] sm:$0xff] %v108_v9 }

// kernel: vae_transformer_forward.6
= control target key start
LH: loop header
LB: loop body
LE: loop exit
PB: predicated region body
PF: predicated region fallthrough
CT: control target
= control target key end

     0   :  { %s1844_s0 = inlined_call_operand.vmem [shape: s32[2], index: 0, kind: input, shape index: {}]   ;;  %s1845_s1 = inlined_call_operand.vmem [shape: f32[2,8,32], index: 1, kind: input, shape index: {}]   ;;  %s1846_s2 = inlined_call_operand.vmem [shape: bf16[32,96], index: 2, kind: input, shape index: {}]   ;;  %s1847_s3 = inlined_call_operand.vmem [shape: f32[1,96], index: 3, kind: input, shape index: {}]   ;;  %s1848_s4 = inlined_call_operand.vmem [shape: bf16[32,32], index: 4, kind: input, shape index: {}]   ;;  %s1849_s5 = inlined_call_operand.vmem [shape: f32[1,32], index: 5, kind: input, shape index: {}]   ;;  %s1850_s6 = inlined_call_operand.vmem [shape: f32[1,32], index: 6, kind: input, shape index: {}]   ;;  %s1851_s7 = inlined_call_operand.vmem [shape: f32[1,32], index: 7, kind: input, shape index: {}]   ;;  %s1852_s8 = inlined_call_operand.vmem [shape: bf16[32,64], index: 8, kind: input, shape index: {}]   ;;  %s1853_s9 = inlined_call_operand.vmem [shape: f32[1,64], index: 9, kind: input, shape index: {}]   ;;  %s1854_s10 = inlined_call_operand.vmem [shape: bf16[64,32], index: 10, kind: input, shape index: {}]   ;;  %s1855_s11 = inlined_call_operand.vmem [shape: f32[1,32], index: 11, kind: input, shape index: {}]   ;;  %s1856_s12 = inlined_call_operand.vmem [shape: f32[1,32], index: 12, kind: input, shape index: {}]   ;;  %s1857_s13 = inlined_call_operand.vmem [shape: f32[1,32], index: 13, kind: input, shape index: {}]   ;;  %s1858_s14 = inlined_call_operand.vmem [shape: bf16[2,8,32], index: 14, kind: output, shape index: {}]  }
   0x1   :  { %s19_s15 = sshll.u32 %s1844_s0, 4  ;;  %s20_s15 = int_to_ptr.vmem [resolvable:$true] %s19_s15 }
   0x2   :  { %s1554_s16 = scalar_lea.vmem %s20_s15, 16  ;;  %p1559_p1 = scmp.lt.s32.totalorder %s20_s15, %s20_s15 }
   0x3   :  { %p1555_p0 = scmp.ne.s32.totalorder %s20_s15, %s1554_s16  ;;  %p1560_p2 = scmp.lt.s32.totalorder %s1554_s16, %s1554_s16 }
   0x5   :  { %p1561_p3 = por %p1560_p2, %p1559_p1 }
   0x7   :  { %p1562_p4 = pnand %p1561_p3, %p1555_p0 }
   0x9   :  { %1565 = shalt.err (!%p1562_p4)  }
   0xa   :  { %s1576_s17 = smov [#allocation4]  }
   0xb   :  { %22 = dma.vmem_to_smem %s20_s15, 16, %s1576_s17, [#allocation3] }
   0xc   :  { %1570 = dma.done.wait [#allocation3], 16 }
   0xd   :  { %1571 = vsyncadd [#allocation3], 4294967280 }
   0xe   :  { %24 = sfence }
   0xf   :  { %s1672_s18 = smov 0  }
  0x10 LB: > { %s1678_s0 = sadd.s32 4294967295, %s1574_s18   ;;  %p1343_p5 = scmp.ge.s32.totalorder %s1574_s18, 1  ;;  %s1574_s18 = sphi %s1672_s18, %s30_s18  }
  0x11   : > { %p393_p6 = scmp.lt.s32.totalorder %s1574_s18, 3 }
  0x13   : > { %p394_p7 = pnand %p1343_p5, %p393_p6 }
  0x14   : > { %p435_p8 = scmp.lt.s32.totalorder (!%p394_p7), %s1678_s0, 1  ;;  %s1579_s30 = smov (!%p394_p7), 120  }
  0x15   : > { %397 = sbr.rel (%p394_p7) target bundleno = 2459 (0x99b), region = 72  ;;  %s1580_s15 = smov (!%p394_p7), 96  }
  0x16   : > { %s1581_s16 = smov (!%p394_p7), 80   ;;  %s1582_s17 = smov (!%p394_p7), 88  }
  0x17   : > { %s1583_s19 = smov (!%p394_p7), 72   ;;  %s1584_s20 = smov (!%p394_p7), 112  }
  0x18   : > { %s1585_s21 = smov (!%p394_p7), 104   ;;  %s444_s22 = sld [smem:[#allocation4 + %s1678_s0]] (!%p394_p7) }
  0x19   : > { %s1589_s25 = smov (!%p394_p7), 40   ;;  %s1590_s26 = smov (!%p394_p7), 48  }
  0x1a   : > { %v1524_v0 = vld [vmem:[%s1846_s2 + $0x8] sm:$0xff]   ;;  %v1577_v1 = vmov 0.0   ;;  %v1525_v2 = vld [vmem:[%s1846_s2] sm:$0xff]   ;;  %vm1578_vm0 = vmmov 0   ;;  %s1697_s23 = scalar_select %p435_p8, %s1678_s0, 1  ;;  %vm470_vm1 = vcmask 261120   ;;  %v514_v23 = vlaneseq }
  0x1b   : > { %1414 = vmatprep.subr.bf16.mxu0 %v1577_v1  ;;  %1422 = vmatprep.subr.bf16.mxu1 %v1577_v1  ;;  %v1346_v5 = vld [vmem:[%s1847_s3] ss:$0 sm:$0xff]  ;;  %vm527_vm2 = vcmask 64512   ;;  %v1586_v27 = vmov -1e+09   ;;  %s1587_s0 = smov 56  }
  0x1c   : > { %1415 = vmatpush3.bf16.msra.mxu0 %v1524_v0  ;;  %1418 = vmatprep.mubr.msk.bf16.mxu0 %vm1578_vm0, %v1577_v1  ;;  %s1344_s24 = sshll.u32 %s1697_s23, 3  ;;  %v515_v24 = vand.u32 127, %v514_v23  ;;  %v520_v26 = vshrl.u32 %v514_v23, 7  ;;  %vm593_vm5 = vcmask 1043456   ;;  %vm638_vm6 = vcmask 60416  }
  0x1d   : > { %1416 = vmatprep.subr.bf16.mxu0 %v1577_v1  ;;  %1424 = vmatprep.mubr.msk.bf16.mxu1 %vm1578_vm0, %v1577_v1  ;;  %s438_s27 = scalar_lea.vmem %s1845_s1, %s1344_s24  ;;  %s1588_s24 = smov 64   ;;  %vm759_vm7 = vcmask 126016   ;;  %vm880_vm8 = vcmask 191616   ;;  %vm1001_vm9 = vcmask 257216   ;;  %vm1209_vm10 = vcmask 523264  }
  0x1e   : > { %v1704_v3 = vld [vmem:[%s438_s27] sm:$0xff]  ;;  %v516_v25 = vstv %s444_s22  ;;  %vm521_vm4 = vcmp.ge.s32.totalorder %v520_v26, %v515_v24  ;;  %s1591_s27 = smov 8   ;;  %vm1284_vm11 = vcmask 257024  }
  0x1f   : > { %v446_v4 = vpack.c.bf16 %v1704_v3, %v1704_v3  ;;  %vm517_vm3 = vcmp.lt.s32.totalorder %v515_v24, %v516_v25 }
  0x20   : > { %1417 = vmatpush3.bf16.msra.mxu0 %v1525_v2  ;;  %v518_v28 = vsel %vm517_vm3, 0.0, %v1586_v27 }
  0x21   : > { %1428 = vmatprep.subr.bf16.mxu0 %v1577_v1  ;;  %v522_v30 = vsel %vm521_vm4, %v518_v28, -1e+09 }
  0x23   : > { %1419 = vmatmul.mubr.msk.bf16.vlgmr.msra.gmra.mxu0 %vm470_vm1, %v446_v4 }
  0x24   : > { %1430 = vmatprep.mubr.msk.bf16.mxu0 %vm1578_vm0, %v1577_v1 }
  0xe3   : > { %v508_v6 = vpop.f32.mrf.mxu0 }
  0xe4   : > { %v509_v7 = vadd.f32 %v1346_v5, %v508_v6 }
  0xe5   : > { %v1420_v8 = vpop.f32.mrf.mxu0 }
  0xe6   : > { %v1714_v9 = vpack.c.bf16 %v509_v7, %v509_v7 }
  0xe7   : > { %v511_v10 = vpop.f32.mrf.mxu0 }
  0xe8   : > { %640 = vrot.lane.b32.xlu1 %v1714_v9, %s1579_s30  ;;  %525 = vrot.lane.b32.xlu0 %v1714_v9, %s1580_s15  ;;  %s1345_s30 = sshll.u32 %s1697_s23, 2 }
  0xe9   : > { %v1421_v11 = vpop.f32.mrf.mxu0 }
  0xec   : > { %763 = vrot.lane.b32.xlu1 %v1714_v9, %s1581_s16  ;;  %642 = vrot.lane.b32.xlu0 %v1714_v9, %s1582_s17  ;;  %s1592_s16 = smov 16   ;;  %s1593_s17 = smov 24  }
  0xf0   : > { %884 = vrot.lane.b32.xlu1 %v1714_v9, %s1583_s19  ;;  %761 = vrot.lane.b32.xlu0 %v1714_v9, %s1584_s20 }
  0xf4   : > { %882 = vrot.lane.b32.xlu0 %v1714_v9, %s1585_s21 }
 0x15a   : > { %v526_v12 = vpop.permute.xlu0 %525  ;;  %v641_v15 = vpop.permute.xlu1 %640 }
 0x15b   : > { %v532_v13 = vsel %vm527_vm2, %v526_v12, 0 }
 0x15c   : > { %1423 = vmatpush3.bf16.xpose.msra.mxu1 %v532_v13 }
 0x15d   : > { %1434 = vmatprep.subr.bf16.mxu1 %v1577_v1 }
 0x15e   : > { %v643_v14 = vpop.permute.xlu0 %642  ;;  %v764_v17 = vpop.permute.xlu1 %763 }
 0x15f   : > { %v648_v16 = vsel %vm527_vm2, %v643_v14, 0  ;;  %v769_v18 = vsel %vm527_vm2, %v764_v17, 0 }
 0x162   : > { %v885_v19 = vpop.permute.xlu1 %884  ;;  %v762_v20 = vpop.permute.xlu0 %761 }
 0x163   : > { %1425 = vmatmul.mubr.msk.bf16.vlgmr.msra.gmra.mxu1 %vm527_vm2, %v1714_v9  ;;  %v890_v21 = vsel %vm527_vm2, %v885_v19, 0 }
 0x164   : > { %1435 = vmatpush3.bf16.xpose.msra.mxu1 %v648_v16  ;;  %1436 = vmatprep.mubr.msk.bf16.mxu1 %vm1578_vm0, %v1577_v1 }
 0x165   : > { %1446 = vmatprep.subr.bf16.mxu1 %v1577_v1 }
 0x166   : > { %v883_v22 = vpop.permute.xlu0 %882 }
 0x16b   : > { %1437 = vmatmul.mubr.msk.bf16.vlgmr.msra.gmra.mxu1 %vm527_vm2, %v641_v15 }
 0x16c   : > { %1447 = vmatpush3.bf16.xpose.msra.mxu1 %v769_v18  ;;  %1448 = vmatprep.mubr.msk.bf16.mxu1 %vm1578_vm0, %v1577_v1 }
 0x16d   : > { %1458 = vmatprep.subr.bf16.mxu1 %v1577_v1 }
 0x173   : > { %1449 = vmatmul.mubr.msk.bf16.vlgmr.msra.gmra.mxu1 %vm527_vm2, %v762_v20 }
 0x174   : > { %1459 = vmatpush3.bf16.xpose.msra.mxu1 %v890_v21  ;;  %1460 = vmatprep.mubr.msk.bf16.mxu1 %vm1578_vm0, %v1577_v1 }
 0x175   : > { %1470 = vmatprep.subr.bf16.mxu1 %v1577_v1 }
 0x17b   : > { %1461 = vmatmul.mubr.msk.bf16.vlgmr.msra.gmra.mxu1 %vm527_vm2, %v883_v22 }
 0x17c   : > { %1474 = vmatprep.mubr.msk.bf16.mxu1 %vm1578_vm0, %v1577_v1 }
 0x223   : > { %v568_v29 = vpop.f32.mrf.mxu1 }
 0x224   : > { %v574_v31 = vmul.f32 0.35355338, %v568_v29 }
 0x225   : > { %v1426_v32 = vpop.f32.mrf.mxu1 }
 0x226   : > { %v575_v33 = vadd.f32 %v574_v31, %v522_v30 }
 0x227   : > { %v571_v34 = vpop.f32.mrf.mxu1 }
 0x228   : > { %v576_v35 = vsel %vm527_vm2, %v575_v33, -inf }
 0x229   : > { %577 = vmax.xlane.f32.xlu1 %v576_v35  ;;  %v1427_v36 = vpop.f32.mrf.mxu1 }
 0x22b   : > { %v684_v37 = vpop.f32.mrf.mxu1 }
 0x22c   : > { %v690_v38 = vmul.f32 0.35355338, %v684_v37 }
 0x22d   : > { %v1438_v39 = vpop.f32.mrf.mxu1 }
 0x22e   : > { %v691_v40 = vadd.f32 %v690_v38, %v522_v30 }
 0x22f   : > { %v687_v41 = vpop.f32.mrf.mxu1 }
 0x230   : > { %v692_v42 = vsel %vm527_vm2, %v691_v40, -inf }
 0x231   : > { %693 = vmax.xlane.f32.xlu0 %v692_v42  ;;  %v1439_v43 = vpop.f32.mrf.mxu1 }
 0x233   : > { %v805_v44 = vpop.f32.mrf.mxu1 }
 0x234   : > { %v811_v45 = vmul.f32 0.35355338, %v805_v44 }
 0x235   : > { %v1450_v46 = vpop.f32.mrf.mxu1 }
 0x236   : > { %v812_v47 = vadd.f32 %v811_v45, %v522_v30 }
 0x237   : > { %v808_v48 = vpop.f32.mrf.mxu1 }
 0x238   : > { %v813_v49 = vsel %vm527_vm2, %v812_v47, -inf }
 0x239   : > { %814 = vmax.xlane.f32.xlu0 %v813_v49  ;;  %v1451_v50 = vpop.f32.mrf.mxu1 }
 0x23a   : > { %v1526_v50 = vld [vmem:[%s1848_s4 + $0x8] sm:$0xff]  }
 0x23b   : > { %v926_v51 = vpop.f32.mrf.mxu1  ;;  %1471 = vmatpush3.bf16.msra.mxu1 %v1526_v50 }
 0x23c   : > { %v932_v52 = vmul.f32 0.35355338, %v926_v51  ;;  %1472 = vmatprep.subr.bf16.mxu1 %v1577_v1 }
 0x23d   : > { %v1462_v53 = vpop.f32.mrf.mxu1 }
 0x23e   : > { %v933_v54 = vadd.f32 %v932_v52, %v522_v30  ;;  %v1527_v53 = vld [vmem:[%s1848_s4] sm:$0xff]  }
 0x23f   : > { %v929_v55 = vpop.f32.mrf.mxu1  ;;  %1473 = vmatpush3.bf16.msra.mxu1 %v1527_v53 }
 0x240   : > { %v934_v56 = vsel %vm527_vm2, %v933_v54, -inf  ;;  %1486 = vmatprep.subr.bf16.mxu1 %v1577_v1 }
 0x241   : > { %935 = vmax.xlane.f32.xlu1 %v934_v56  ;;  %v1463_v57 = vpop.f32.mrf.mxu1 }
 0x2b2   : > { %v578_v58 = vpop.xlane.xlu1 %577 }
 0x2b3   : > { %v579_v59 = vsub.f32 %v575_v33, %v578_v58 }
 0x2b5   : > { %v580_v60 = vmul.f32 1.442695, %v579_v59 }
 0x2b7   : > { %1534 = vpow2.f32 %v580_v60 }
 0x2ba   : > { %v694_v61 = vpop.xlane.xlu0 %693 }
 0x2bb   : > { %v695_v62 = vsub.f32 %v691_v40, %v694_v61 }
 0x2bd   : > { %v696_v63 = vmul.f32 1.442695, %v695_v62 }
 0x2bf   : > { %1536 = vpow2.f32 %v696_v63 }
 0x2c2   : > { %v815_v0 = vpop.xlane.xlu0 %814 }
 0x2c3   : > { %v816_v2 = vsub.f32 %v812_v47, %v815_v0 }
 0x2c4   : > { %v1535_v4 = vpop.eup %1534 }
 0x2c5   : > { %v817_v5 = vmul.f32 1.442695, %v816_v2  ;;  %v582_v6 = vsel %vm527_vm2, %v1535_v4, 0.0 }
 0x2c6   : > { %583 = vadd.xlane.f32.xlu0 %v582_v6 }
 0x2c7   : > { %1538 = vpow2.f32 %v817_v5 }
 0x2ca   : > { %v936_v12 = vpop.xlane.xlu1 %935 }
 0x2cb   : > { %v937_v13 = vsub.f32 %v933_v54, %v936_v12 }
 0x2cc   : > { %v1537_v7 = vpop.eup %1536 }
 0x2cd   : > { %v698_v8 = vsel %vm527_vm2, %v1537_v7, 0.0  ;;  %v938_v14 = vmul.f32 1.442695, %v937_v13 }
 0x2ce   : > { %699 = vadd.xlane.f32.xlu1 %v698_v8 }
 0x2cf   : > { %1540 = vpow2.f32 %v938_v14 }
 0x2d4   : > { %v1539_v10 = vpop.eup %1538 }
 0x2d5   : > { %v819_v11 = vsel %vm527_vm2, %v1539_v10, 0.0 }
 0x2d6   : > { %820 = vadd.xlane.f32.xlu0 %v819_v11 }
 0x2dc   : > { %v1541_v15 = vpop.eup %1540 }
 0x2dd   : > { %v940_v16 = vsel %vm527_vm2, %v1541_v15, 0.0 }
 0x2df   : > { %704 = vrot.lane.b32.xlu1 %v1714_v9, %s1587_s0 }
 0x2ec   : > { %588 = vrot.lane.b32.xlu0 %v1714_v9, %s1588_s24 }
 0x2f0   : > { %946 = vrot.lane.b32.xlu0 %v1714_v9, %s1589_s25 }
 0x303   : > { %941 = vadd.xlane.f32.xlu1 %v940_v16 }
 0x314   : > { %825 = vrot.lane.b32.xlu1 %v1714_v9, %s1590_s26 }
 0x34f   : > { %v584_v17 = vpop.xlane.xlu0 %583 }
 0x350   : > { %1542 = vrcp.f32 %v584_v17 }
 0x357   : > { %v700_v18 = vpop.xlane.xlu1 %699 }
 0x358   : > { %1544 = vrcp.f32 %v700_v18  ;;  %v1528_v18 = vld [vmem:[%s1852_s8 + $0x8] sm:$0xff]  }
 0x35b   : > { %v705_v24 = vpop.permute.xlu1 %704 }
 0x35c   : > { %v710_v27 = vsel %vm593_vm5, %v705_v24, 0 }
 0x35d   : > { %v1543_v19 = vpop.eup %1542 }
 0x35e   : > { %v586_v21 = vmul.f32 %v1543_v19, %v1535_v4  ;;  %v1361_v4 = vld [vmem:[%s1849_s5] ss:$0 sm:$0xff]  ;;  %v1530_v19 = vld [vmem:[%s1854_s10 + $0x18] sm:$0xff]  }
 0x35f   : > { %v821_v20 = vpop.xlane.xlu0 %820 }
 0x360   : > { %v587_v25 = vpack.c.bf16 %v586_v21, %v586_v21  ;;  %1546 = vrcp.f32 %v821_v20  ;;  %v1531_v20 = vld [vmem:[%s1854_s10 + $0x10] sm:$0xff]  }
 0x363   : > { %v589_v22 = vpop.permute.xlu0 %588 }
 0x364   : > { %v595_v23 = vsel %vm593_vm5, %v589_v22, 0 }
 0x365   : > { %1429 = vmatpush3.bf16.msra.mxu0 %v595_v23  ;;  %v1545_v26 = vpop.eup %1544 }
 0x366   : > { %1440 = vmatprep.subr.bf16.mxu0 %v1577_v1  ;;  %v702_v9 = vmul.f32 %v1545_v26, %v1537_v7 }
 0x367   : > { %v947_v34 = vpop.permute.xlu0 %946 }
 0x368   : > { %1431 = vmatmul.mubr.msk.bf16.vlgmr.msra.gmra.mxu0 %vm527_vm2, %v587_v25  ;;  %v703_v28 = vpack.c.bf16 %v702_v9, %v702_v9  ;;  %v952_v36 = vsel %vm593_vm5, %v947_v34, 0  ;;  %v1365_v25 = vld [vmem:[%s1850_s6] ss:$0 sm:$0xff] }
 0x369   : > { %1441 = vmatpush3.bf16.msra.mxu0 %v710_v27  ;;  %1442 = vmatprep.mubr.msk.bf16.mxu0 %vm1578_vm0, %v1577_v1  ;;  %v1366_v27 = vld [vmem:[%s1851_s7] ss:$0 sm:$0xff] }
 0x36a   : > { %1452 = vmatprep.subr.bf16.mxu0 %v1577_v1 }
 0x36d   : > { %v1547_v29 = vpop.eup %1546 }
 0x36e   : > { %v823_v31 = vmul.f32 %v1547_v29, %v1539_v10 }
 0x370   : > { %1443 = vmatmul.mubr.msk.bf16.vlgmr.msra.gmra.mxu0 %vm527_vm2, %v703_v28  ;;  %v824_v35 = vpack.c.bf16 %v823_v31, %v823_v31  ;;  %v1533_v31 = vld [vmem:[%s1854_s10] sm:$0xff]  }
 0x371   : > { %1454 = vmatprep.mubr.msk.bf16.mxu0 %vm1578_vm0, %v1577_v1 }
 0x38c   : > { %v942_v30 = vpop.xlane.xlu1 %941 }
 0x38d   : > { %1548 = vrcp.f32 %v942_v30  ;;  %v1532_v30 = vld [vmem:[%s1854_s10 + $0x8] sm:$0xff]  }
 0x390   : > { %v826_v32 = vpop.permute.xlu1 %825 }
 0x391   : > { %v831_v33 = vsel %vm593_vm5, %v826_v32, 0  ;;  %v1367_v32 = vld [vmem:[%s1853_s9] ss:$0 sm:$0xff] }
 0x392   : > { %1453 = vmatpush3.bf16.msra.mxu0 %v831_v33 }
 0x393   : > { %1464 = vmatprep.subr.bf16.mxu0 %v1577_v1 }
 0x395   : > { %1455 = vmatmul.mubr.msk.bf16.vlgmr.msra.gmra.mxu0 %vm527_vm2, %v824_v35 }
 0x396   : > { %1465 = vmatpush3.bf16.msra.mxu0 %v952_v36  ;;  %1466 = vmatprep.mubr.msk.bf16.mxu0 %vm1578_vm0, %v1577_v1 }
 0x397   : > { %1478 = vmatprep.subr.bf16.mxu0 %v1577_v1 }
 0x39a   : > { %v1549_v37 = vpop.eup %1548 }
 0x39b   : > { %v944_v38 = vmul.f32 %v1549_v37, %v1541_v15 }
 0x39d   : > { %v945_v39 = vpack.c.bf16 %v944_v38, %v944_v38 }
 0x39f   : > { %1467 = vmatmul.mubr.msk.bf16.vlgmr.msra.gmra.mxu0 %vm527_vm2, %v945_v39 }
 0x3a0   : > { %1482 = vmatprep.mubr.msk.bf16.mxu0 %vm1578_vm0, %v1577_v1  ;;  %1479 = vmatpush3.bf16.msra.mxu0 %v1528_v18 }
 0x3a1   : > { %1480 = vmatprep.subr.bf16.mxu0 %v1577_v1 }
 0x428   : > { %v631_v40 = vpop.f32.mrf.mxu0 }
 0x429   : > { %v637_v41 = vpack.c.bf16 %v631_v40, %v631_v40 }
 0x42a   : > { %v1432_v42 = vpop.f32.mrf.mxu0 }
 0x42b   : > { %639 = vst.msk [vmem:[#allocation2] sm:$0xf] %vm638_vm6, %v637_v41 }
 0x42c   : > { %v634_v43 = vpop.f32.mrf.mxu0 }
 0x42e   : > { %v1433_v44 = vpop.f32.mrf.mxu0 }
 0x430   : > { %v746_v45 = vpop.f32.mrf.mxu0 }
 0x431   : > { %v1381_v46 = vpack.c.bf16 %v746_v45, %v746_v45 }
 0x432   : > { %v1444_v47 = vpop.f32.mrf.mxu0 }
 0x433   : > { %756 = vrot.lane.b32.xlu1 %v1381_v46, %s1591_s27 }
 0x434   : > { %v749_v48 = vpop.f32.mrf.mxu0 }
 0x436   : > { %v1445_v49 = vpop.f32.mrf.mxu0 }
 0x455   : > { %v867_v51 = vpop.f32.mrf.mxu0 }
 0x456   : > { %v1382_v52 = vpack.c.bf16 %v867_v51, %v867_v51 }
 0x457   : > { %v1456_v54 = vpop.f32.mrf.mxu0 }
 0x458   : > { %877 = vrot.lane.b32.xlu0 %v1382_v52, %s1592_s16 }
 0x459   : > { %v870_v55 = vpop.f32.mrf.mxu0 }
 0x45b   : > { %v1457_v56 = vpop.f32.mrf.mxu0 }
 0x45c   : > { %v1377_v56 = vld [vmem:[%s1856_s12] ss:$0 sm:$0xff] }
 0x45f   : > { %v988_v57 = vpop.f32.mrf.mxu0 }
 0x460   : > { %v1383_v58 = vpack.c.bf16 %v988_v57, %v988_v57 }
 0x461   : > { %v1468_v59 = vpop.f32.mrf.mxu0 }
 0x462   : > { %998 = vrot.lane.b32.xlu1 %v1383_v58, %s1593_s17  ;;  %v1378_v58 = vld [vmem:[%s1857_s13] ss:$0 sm:$0xff]  ;;  %s442_s17 = scalar_lea.vmem %s1858_s14, %s1345_s30 }
 0x463   : > { %v991_v60 = vpop.f32.mrf.mxu0 }
 0x465   : > { %v1469_v61 = vpop.f32.mrf.mxu0 }
 0x4a5   : > { %v757_v62 = vpop.permute.xlu1 %756 }
 0x4a6   : > { %760 = vst.msk [vmem:[#allocation2] sm:$0xf] %vm759_vm7, %v757_v62 }
 0x4ca   : > { %v878_v63 = vpop.permute.xlu0 %877 }
 0x4cb   : > { %881 = vst.msk [vmem:[#allocation2] sm:$0xf] %vm880_vm8, %v878_v63 }
 0x4d4   : > { %v999_v0 = vpop.permute.xlu1 %998 }
 0x4d5   : > { %1002 = vst.msk [vmem:[#allocation2] sm:$0xf] %vm1001_vm9, %v999_v0 }
 0x4dc   : > { %v1003_v2 = vld [vmem:[#allocation2] sm:$0xf] }
 0x4dd   : > { %1475 = vmatmul.mubr.msk.bf16.vlgmr.msra.gmra.mxu1 %vm470_vm1, %v1003_v2 }
 0x4de   : > { %1494 = vmatprep.mubr.msk.bf16.mxu1 %vm1578_vm0, %v1577_v1  ;;  %1487 = vmatpush3.bf16.msra.mxu1 %v1530_v19 }
 0x4df   : > { %1488 = vmatprep.subr.bf16.mxu1 %v1577_v1 }
 0x4e2   : > { %1489 = vmatpush3.bf16.msra.mxu1 %v1531_v20 }
 0x4e3   : > { %1490 = vmatprep.subr.bf16.mxu1 %v1577_v1 }
 0x4e6   : > { %1491 = vmatpush3.bf16.msra.mxu1 %v1532_v30 }
 0x4e7   : > { %1492 = vmatprep.subr.bf16.mxu1 %v1577_v1  ;;  %v1371_v1 = vld [vmem:[%s1855_s11] ss:$0 sm:$0xff] }
 0x4ea   : > { %1493 = vmatpush3.bf16.msra.mxu1 %v1533_v31 }
 0x59d   : > { %v1064_v5 = vpop.f32.mrf.mxu1 }
 0x59e   : > { %v1065_v6 = vadd.f32 %v1361_v4, %v1064_v5 }
 0x59f   : > { %v1476_v7 = vpop.f32.mrf.mxu1 }
 0x5a0   : > { %v1070_v8 = vadd.f32 %v1065_v6, %v1704_v3  ;;  %v1529_v3 = vld [vmem:[%s1852_s8] sm:$0xff]  }
 0x5a1   : > { %v1067_v10 = vpop.f32.mrf.mxu1  ;;  %1481 = vmatpush3.bf16.msra.mxu0 %v1529_v3 }
 0x5a2   : > { %v1073_v11 = vsel %vm470_vm1, %v1070_v8, 0.0 }
 0x5a3   : > { %1074 = vadd.xlane.f32.xlu0 %v1073_v11  ;;  %v1477_v12 = vpop.f32.mrf.mxu1 }
 0x62c   : > { %v1075_v13 = vpop.xlane.xlu0 %1074 }
 0x62d   : > { %v1077_v14 = vmul.f32 0.03125, %v1075_v13 }
 0x62f   : > { %v1078_v15 = vsub.f32 %v1070_v8, %v1077_v14 }
 0x631   : > { %v1079_v16 = vmul.f32 %v1078_v15, %v1078_v15 }
 0x633   : > { %v1080_v17 = vsel %vm470_vm1, %v1079_v16, 0.0 }
 0x634   : > { %1081 = vadd.xlane.f32.xlu1 %v1080_v17 }
 0x6bd   : > { %v1082_v21 = vpop.xlane.xlu1 %1081 }
 0x6be   : > { %v1083_v22 = vmul.f32 0.03125, %v1082_v21 }
 0x6c0   : > { %v1084_v23 = vadd.f32 1e-05, %v1083_v22 }
 0x6c2   : > { %1550 = vrsqrt.f32 %v1084_v23 }
 0x6cf   : > { %v1551_v24 = vpop.eup %1550 }
 0x6d0   : > { %v1086_v26 = vmul.f32 %v1551_v24, %v1078_v15 }
 0x6d2   : > { %v1093_v9 = vmul.f32 %v1365_v25, %v1086_v26 }
 0x6d4   : > { %v1100_v28 = vadd.f32 %v1366_v27, %v1093_v9 }
 0x6d6   : > { %v1101_v29 = vpack.c.bf16 %v1100_v28, %v1100_v28 }
 0x6d8   : > { %1483 = vmatmul.mubr.msk.bf16.vlgmr.msra.gmra.mxu0 %vm470_vm1, %v1101_v29 }
 0x798   : > { %v1162_v33 = vpop.f32.mrf.mxu0 }
 0x799   : > { %v1163_v34 = vadd.f32 %v1367_v32, %v1162_v33 }
 0x79a   : > { %v1484_v35 = vpop.f32.mrf.mxu0 }
 0x79b   : > { %v1168_v36 = vmax.f32 %v1163_v34, 0.0 }
 0x79c   : > { %v1165_v37 = vpop.f32.mrf.mxu0 }
 0x79d   : > { %v1169_v38 = vpack.c.bf16 %v1168_v36, %v1168_v36 }
 0x79e   : > { %v1485_v39 = vpop.f32.mrf.mxu0 }
 0x79f   : > { %1495 = vmatmul.mubr.msk.bf16.vlgmr.msra.gmra.mxu1 %vm1209_vm10, %v1169_v38 }
 0x85f   : > { %v1247_v40 = vpop.f32.mrf.mxu1 }
 0x860   : > { %v1248_v41 = vadd.f32 %v1371_v1, %v1247_v40 }
 0x861   : > { %v1496_v42 = vpop.f32.mrf.mxu1 }
 0x862   : > { %v1253_v43 = vadd.f32 %v1248_v41, %v1100_v28 }
 0x863   : > { %v1250_v44 = vpop.f32.mrf.mxu1 }
 0x864   : > { %v1256_v45 = vsel %vm470_vm1, %v1253_v43, 0.0 }
 0x865   : > { %1257 = vadd.xlane.f32.xlu0 %v1256_v45  ;;  %v1497_v46 = vpop.f32.mrf.mxu1 }
 0x8ee   : > { %v1258_v47 = vpop.xlane.xlu0 %1257 }
 0x8ef   : > { %v1259_v48 = vmul.f32 0.03125, %v1258_v47 }
 0x8f1   : > { %v1260_v49 = vsub.f32 %v1253_v43, %v1259_v48 }
 0x8f3   : > { %v1261_v50 = vmul.f32 %v1260_v49, %v1260_v49 }
 0x8f5   : > { %v1262_v51 = vsel %vm470_vm1, %v1261_v50, 0.0 }
 0x8f6   : > { %1263 = vadd.xlane.f32.xlu0 %v1262_v51 }
 0x97f   : > { %v1264_v52 = vpop.xlane.xlu0 %1263 }
 0x980   : > { %v1265_v53 = vmul.f32 0.03125, %v1264_v52 }
 0x982   : > { %v1266_v54 = vadd.f32 1e-05, %v1265_v53 }
 0x984   : > { %1552 = vrsqrt.f32 %v1266_v54 }
 0x991   : > { %v1553_v55 = vpop.eup %1552 }
 0x992   : > { %v1268_v57 = vmul.f32 %v1553_v55, %v1260_v49 }
 0x994   : > { %v1275_v59 = vmul.f32 %v1377_v56, %v1268_v57 }
 0x996   : > { %v1282_v60 = vadd.f32 %v1378_v58, %v1275_v59 }
 0x998   : > { %v1283_v61 = vpack.c.bf16 %v1282_v60, %v1282_v60 }
 0x99a   : > { %1285 = vst.msk [vmem:[%s442_s17] sm:$0xf] %vm1284_vm11, %v1283_v61 }
 0x99b PF: > { %s30_s18 = sadd.s32 1, %s1574_s18  }
 0x99c   : > { %p27_p9 = scmp.ge.s32.totalorder %s30_s18, 4  }
 0x99e   :  { %29 = sbr.rel (!%p27_p9) target bundleno = 16 (0x10), region = 102 }

// kernel: vae_transformer_forward.4
= control target key start
LH: loop header
LB: loop body
LE: loop exit
PB: predicated region body
PF: predicated region fallthrough
CT: control target
= control target key end

     0   :  { %s1840_s0 = inlined_call_operand.vmem [shape: s32[2], index: 0, kind: input, shape index: {}]   ;;  %s1841_s1 = inlined_call_operand.vmem [shape: f32[2,8,32], index: 1, kind: input, shape index: {}]   ;;  %s1842_s2 = inlined_call_operand.vmem [shape: bf16[32,96], index: 2, kind: input, shape index: {}]   ;;  %s1843_s3 = inlined_call_operand.vmem [shape: f32[1,96], index: 3, kind: input, shape index: {}]   ;;  %s1844_s4 = inlined_call_operand.vmem [shape: bf16[32,32], index: 4, kind: input, shape index: {}]   ;;  %s1845_s5 = inlined_call_operand.vmem [shape: f32[1,32], index: 5, kind: input, shape index: {}]   ;;  %s1846_s6 = inlined_call_operand.vmem [shape: f32[1,32], index: 6, kind: input, shape index: {}]   ;;  %s1847_s7 = inlined_call_operand.vmem [shape: f32[1,32], index: 7, kind: input, shape index: {}]   ;;  %s1848_s8 = inlined_call_operand.vmem [shape: bf16[32,64], index: 8, kind: input, shape index: {}]   ;;  %s1849_s9 = inlined_call_operand.vmem [shape: f32[1,64], index: 9, kind: input, shape index: {}]   ;;  %s1850_s10 = inlined_call_operand.vmem [shape: bf16[64,32], index: 10, kind: input, shape index: {}]   ;;  %s1851_s11 = inlined_call_operand.vmem [shape: f32[1,32], index: 11, kind: input, shape index: {}]   ;;  %s1852_s12 = inlined_call_operand.vmem [shape: f32[1,32], index: 12, kind: input, shape index: {}]   ;;  %s1853_s13 = inlined_call_operand.vmem [shape: f32[1,32], index: 13, kind: input, shape index: {}]   ;;  %s1854_s14 = inlined_call_operand.vmem [shape: bf16[2,8,32], index: 14, kind: output, shape index: {}]  }
   0x1   :  { %s19_s15 = sshll.u32 %s1840_s0, 4  ;;  %s20_s15 = int_to_ptr.vmem [resolvable:$true] %s19_s15 }
   0x2   :  { %s1550_s16 = scalar_lea.vmem %s20_s15, 16  ;;  %p1555_p1 = scmp.lt.s32.totalorder %s20_s15, %s20_s15 }
   0x3   :  { %p1551_p0 = scmp.ne.s32.totalorder %s20_s15, %s1550_s16  ;;  %p1556_p2 = scmp.lt.s32.totalorder %s1550_s16, %s1550_s16 }
   0x5   :  { %p1557_p3 = por %p1556_p2, %p1555_p1 }
   0x7   :  { %p1558_p4 = pnand %p1557_p3, %p1551_p0 }
   0x9   :  { %1561 = shalt.err (!%p1558_p4)  }
   0xa   :  { %s1572_s17 = smov [#allocation4]  }
   0xb   :  { %22 = dma.vmem_to_smem %s20_s15, 16, %s1572_s17, [#allocation3] }
   0xc   :  { %1566 = dma.done.wait [#allocation3], 16 }
   0xd   :  { %1567 = vsyncadd [#allocation3], 4294967280 }
   0xe   :  { %24 = sfence }
   0xf   :  { %s1668_s18 = smov 0  }
  0x10 LB: > { %s1674_s0 = sadd.s32 4294967295, %s1570_s18   ;;  %p1339_p5 = scmp.ge.s32.totalorder %s1570_s18, 1  ;;  %s1570_s18 = sphi %s1668_s18, %s30_s18  }
  0x11   : > { %p393_p6 = scmp.lt.s32.totalorder %s1570_s18, 3 }
  0x13   : > { %p394_p7 = pnand %p1339_p5, %p393_p6 }
  0x14   : > { %p435_p8 = scmp.lt.s32.totalorder (!%p394_p7), %s1674_s0, 1  ;;  %s1575_s30 = smov (!%p394_p7), 120  }
  0x15   : > { %397 = sbr.rel (%p394_p7) target bundleno = 2459 (0x99b), region = 72  ;;  %s1576_s15 = smov (!%p394_p7), 96  }
  0x16   : > { %s1577_s16 = smov (!%p394_p7), 80   ;;  %s1578_s17 = smov (!%p394_p7), 88  }
  0x17   : > { %s1579_s19 = smov (!%p394_p7), 72   ;;  %s1580_s20 = smov (!%p394_p7), 112  }
  0x18   : > { %s1581_s21 = smov (!%p394_p7), 104   ;;  %s444_s22 = sld [smem:[#allocation4 + %s1674_s0]] (!%p394_p7) }
  0x19   : > { %s1585_s25 = smov (!%p394_p7), 40   ;;  %s1586_s26 = smov (!%p394_p7), 48  }
  0x1a   : > { %v1520_v0 = vld [vmem:[%s1842_s2 + $0x8] sm:$0xff]   ;;  %v1573_v1 = vmov 0.0   ;;  %v1521_v2 = vld [vmem:[%s1842_s2] sm:$0xff]   ;;  %vm1574_vm0 = vmmov 0   ;;  %s1693_s23 = scalar_select %p435_p8, %s1674_s0, 1  ;;  %vm470_vm1 = vcmask 261120   ;;  %v514_v23 = vlaneseq }
  0x1b   : > { %1410 = vmatprep.subr.bf16.mxu0 %v1573_v1  ;;  %1418 = vmatprep.subr.bf16.mxu1 %v1573_v1  ;;  %v1342_v5 = vld [vmem:[%s1843_s3] ss:$0 sm:$0xff]  ;;  %vm523_vm2 = vcmask 64512   ;;  %v1582_v27 = vmov -1e+09   ;;  %s1583_s0 = smov 56  }
  0x1c   : > { %1411 = vmatpush3.bf16.msra.mxu0 %v1520_v0  ;;  %1414 = vmatprep.mubr.msk.bf16.mxu0 %vm1574_vm0, %v1573_v1  ;;  %s1340_s24 = sshll.u32 %s1693_s23, 3  ;;  %v515_v24 = vand.u32 127, %v514_v23  ;;  %vm589_vm4 = vcmask 1043456   ;;  %vm634_vm5 = vcmask 60416   ;;  %vm755_vm6 = vcmask 126016  }
  0x1d   : > { %1412 = vmatprep.subr.bf16.mxu0 %v1573_v1  ;;  %1420 = vmatprep.mubr.msk.bf16.mxu1 %vm1574_vm0, %v1573_v1  ;;  %s438_s27 = scalar_lea.vmem %s1841_s1, %s1340_s24  ;;  %s1584_s24 = smov 64   ;;  %vm876_vm7 = vcmask 191616   ;;  %vm997_vm8 = vcmask 257216   ;;  %vm1205_vm9 = vcmask 523264   ;;  %vm1280_vm10 = vcmask 257024  }
  0x1e   : > { %v1700_v3 = vld [vmem:[%s438_s27] sm:$0xff]  ;;  %v516_v25 = vstv %s444_s22  ;;  %s1587_s27 = smov 8  }
  0x1f   : > { %v446_v4 = vpack.c.bf16 %v1700_v3, %v1700_v3  ;;  %vm517_vm3 = vcmp.lt.s32.totalorder %v515_v24, %v516_v25 }
  0x20   : > { %1413 = vmatpush3.bf16.msra.mxu0 %v1521_v2  ;;  %v518_v28 = vsel %vm517_vm3, 0.0, %v1582_v27 }
  0x21   : > { %1424 = vmatprep.subr.bf16.mxu0 %v1573_v1 }
  0x23   : > { %1415 = vmatmul.mubr.msk.bf16.vlgmr.msra.gmra.mxu0 %vm470_vm1, %v446_v4 }
  0x24   : > { %1426 = vmatprep.mubr.msk.bf16.mxu0 %vm1574_vm0, %v1573_v1 }
  0xe3   : > { %v508_v6 = vpop.f32.mrf.mxu0 }
  0xe4   : > { %v509_v7 = vadd.f32 %v1342_v5, %v508_v6 }
  0xe5   : > { %v1416_v8 = vpop.f32.mrf.mxu0 }
  0xe6   : > { %v1710_v9 = vpack.c.bf16 %v509_v7, %v509_v7 }
  0xe7   : > { %v511_v10 = vpop.f32.mrf.mxu0 }
  0xe8   : > { %636 = vrot.lane.b32.xlu1 %v1710_v9, %s1575_s30  ;;  %521 = vrot.lane.b32.xlu0 %v1710_v9, %s1576_s15  ;;  %s1341_s30 = sshll.u32 %s1693_s23, 2 }
  0xe9   : > { %v1417_v11 = vpop.f32.mrf.mxu0 }
  0xec   : > { %759 = vrot.lane.b32.xlu1 %v1710_v9, %s1577_s16  ;;  %638 = vrot.lane.b32.xlu0 %v1710_v9, %s1578_s17  ;;  %s1588_s16 = smov 16   ;;  %s1589_s17 = smov 24  }
  0xf0   : > { %880 = vrot.lane.b32.xlu1 %v1710_v9, %s1579_s19  ;;  %757 = vrot.lane.b32.xlu0 %v1710_v9, %s1580_s20 }
  0xf4   : > { %878 = vrot.lane.b32.xlu0 %v1710_v9, %s1581_s21 }
 0x15a   : > { %v522_v12 = vpop.permute.xlu0 %521  ;;  %v637_v15 = vpop.permute.xlu1 %636 }
 0x15b   : > { %v528_v13 = vsel %vm523_vm2, %v522_v12, 0 }
 0x15c   : > { %1419 = vmatpush3.bf16.xpose.msra.mxu1 %v528_v13 }
 0x15d   : > { %1430 = vmatprep.subr.bf16.mxu1 %v1573_v1 }
 0x15e   : > { %v639_v14 = vpop.permute.xlu0 %638  ;;  %v760_v17 = vpop.permute.xlu1 %759 }
 0x15f   : > { %v644_v16 = vsel %vm523_vm2, %v639_v14, 0  ;;  %v765_v18 = vsel %vm523_vm2, %v760_v17, 0 }
 0x162   : > { %v881_v19 = vpop.permute.xlu1 %880  ;;  %v758_v20 = vpop.permute.xlu0 %757 }
 0x163   : > { %1421 = vmatmul.mubr.msk.bf16.vlgmr.msra.gmra.mxu1 %vm523_vm2, %v1710_v9  ;;  %v886_v21 = vsel %vm523_vm2, %v881_v19, 0 }
 0x164   : > { %1431 = vmatpush3.bf16.xpose.msra.mxu1 %v644_v16  ;;  %1432 = vmatprep.mubr.msk.bf16.mxu1 %vm1574_vm0, %v1573_v1 }
 0x165   : > { %1442 = vmatprep.subr.bf16.mxu1 %v1573_v1 }
 0x166   : > { %v879_v22 = vpop.permute.xlu0 %878 }
 0x16b   : > { %1433 = vmatmul.mubr.msk.bf16.vlgmr.msra.gmra.mxu1 %vm523_vm2, %v637_v15 }
 0x16c   : > { %1443 = vmatpush3.bf16.xpose.msra.mxu1 %v765_v18  ;;  %1444 = vmatprep.mubr.msk.bf16.mxu1 %vm1574_vm0, %v1573_v1 }
 0x16d   : > { %1454 = vmatprep.subr.bf16.mxu1 %v1573_v1 }
 0x173   : > { %1445 = vmatmul.mubr.msk.bf16.vlgmr.msra.gmra.mxu1 %vm523_vm2, %v758_v20 }
 0x174   : > { %1455 = vmatpush3.bf16.xpose.msra.mxu1 %v886_v21  ;;  %1456 = vmatprep.mubr.msk.bf16.mxu1 %vm1574_vm0, %v1573_v1 }
 0x175   : > { %1466 = vmatprep.subr.bf16.mxu1 %v1573_v1 }
 0x17b   : > { %1457 = vmatmul.mubr.msk.bf16.vlgmr.msra.gmra.mxu1 %vm523_vm2, %v879_v22 }
 0x17c   : > { %1470 = vmatprep.mubr.msk.bf16.mxu1 %vm1574_vm0, %v1573_v1 }
 0x223   : > { %v564_v26 = vpop.f32.mrf.mxu1 }
 0x224   : > { %v570_v29 = vmul.f32 0.35355338, %v564_v26 }
 0x225   : > { %v1422_v30 = vpop.f32.mrf.mxu1 }
 0x226   : > { %v571_v31 = vadd.f32 %v570_v29, %v518_v28 }
 0x227   : > { %v567_v32 = vpop.f32.mrf.mxu1 }
 0x228   : > { %v572_v33 = vsel %vm523_vm2, %v571_v31, -inf }
 0x229   : > { %573 = vmax.xlane.f32.xlu1 %v572_v33  ;;  %v1423_v34 = vpop.f32.mrf.mxu1 }
 0x22b   : > { %v680_v35 = vpop.f32.mrf.mxu1 }
 0x22c   : > { %v686_v36 = vmul.f32 0.35355338, %v680_v35 }
 0x22d   : > { %v1434_v37 = vpop.f32.mrf.mxu1 }
 0x22e   : > { %v687_v38 = vadd.f32 %v686_v36, %v518_v28 }
 0x22f   : > { %v683_v39 = vpop.f32.mrf.mxu1 }
 0x230   : > { %v688_v40 = vsel %vm523_vm2, %v687_v38, -inf }
 0x231   : > { %689 = vmax.xlane.f32.xlu0 %v688_v40  ;;  %v1435_v41 = vpop.f32.mrf.mxu1 }
 0x233   : > { %v801_v42 = vpop.f32.mrf.mxu1 }
 0x234   : > { %v807_v43 = vmul.f32 0.35355338, %v801_v42 }
 0x235   : > { %v1446_v44 = vpop.f32.mrf.mxu1 }
 0x236   : > { %v808_v45 = vadd.f32 %v807_v43, %v518_v28 }
 0x237   : > { %v804_v46 = vpop.f32.mrf.mxu1 }
 0x238   : > { %v809_v47 = vsel %vm523_vm2, %v808_v45, -inf }
 0x239   : > { %810 = vmax.xlane.f32.xlu0 %v809_v47  ;;  %v1447_v48 = vpop.f32.mrf.mxu1 }
 0x23a   : > { %v1522_v48 = vld [vmem:[%s1844_s4 + $0x8] sm:$0xff]  }
 0x23b   : > { %v922_v49 = vpop.f32.mrf.mxu1  ;;  %1467 = vmatpush3.bf16.msra.mxu1 %v1522_v48 }
 0x23c   : > { %v928_v50 = vmul.f32 0.35355338, %v922_v49  ;;  %1468 = vmatprep.subr.bf16.mxu1 %v1573_v1 }
 0x23d   : > { %v1458_v51 = vpop.f32.mrf.mxu1 }
 0x23e   : > { %v929_v52 = vadd.f32 %v928_v50, %v518_v28  ;;  %v1523_v51 = vld [vmem:[%s1844_s4] sm:$0xff]  }
 0x23f   : > { %v925_v53 = vpop.f32.mrf.mxu1  ;;  %1469 = vmatpush3.bf16.msra.mxu1 %v1523_v51 }
 0x240   : > { %v930_v54 = vsel %vm523_vm2, %v929_v52, -inf  ;;  %1482 = vmatprep.subr.bf16.mxu1 %v1573_v1 }
 0x241   : > { %931 = vmax.xlane.f32.xlu1 %v930_v54  ;;  %v1459_v55 = vpop.f32.mrf.mxu1 }
 0x2b2   : > { %v574_v56 = vpop.xlane.xlu1 %573 }
 0x2b3   : > { %v575_v57 = vsub.f32 %v571_v31, %v574_v56 }
 0x2b5   : > { %v576_v58 = vmul.f32 1.442695, %v575_v57 }
 0x2b7   : > { %1530 = vpow2.f32 %v576_v58 }
 0x2ba   : > { %v690_v59 = vpop.xlane.xlu0 %689 }
 0x2bb   : > { %v691_v60 = vsub.f32 %v687_v38, %v690_v59 }
 0x2bd   : > { %v692_v61 = vmul.f32 1.442695, %v691_v60 }
 0x2bf   : > { %1532 = vpow2.f32 %v692_v61 }
 0x2c2   : > { %v811_v62 = vpop.xlane.xlu0 %810 }
 0x2c3   : > { %v812_v63 = vsub.f32 %v808_v45, %v811_v62 }
 0x2c4   : > { %v1531_v0 = vpop.eup %1530 }
 0x2c5   : > { %v813_v2 = vmul.f32 1.442695, %v812_v63  ;;  %v578_v4 = vsel %vm523_vm2, %v1531_v0, 0.0 }
 0x2c6   : > { %579 = vadd.xlane.f32.xlu0 %v578_v4 }
 0x2c7   : > { %1534 = vpow2.f32 %v813_v2 }
 0x2ca   : > { %v932_v10 = vpop.xlane.xlu1 %931 }
 0x2cb   : > { %v933_v11 = vsub.f32 %v929_v52, %v932_v10 }
 0x2cc   : > { %v1533_v5 = vpop.eup %1532 }
 0x2cd   : > { %v694_v6 = vsel %vm523_vm2, %v1533_v5, 0.0  ;;  %v934_v12 = vmul.f32 1.442695, %v933_v11 }
 0x2ce   : > { %695 = vadd.xlane.f32.xlu1 %v694_v6 }
 0x2cf   : > { %1536 = vpow2.f32 %v934_v12 }
 0x2d4   : > { %v1535_v7 = vpop.eup %1534 }
 0x2d5   : > { %v815_v8 = vsel %vm523_vm2, %v1535_v7, 0.0 }
 0x2d6   : > { %816 = vadd.xlane.f32.xlu0 %v815_v8 }
 0x2dc   : > { %v1537_v13 = vpop.eup %1536 }
 0x2dd   : > { %v936_v14 = vsel %vm523_vm2, %v1537_v13, 0.0 }
 0x2df   : > { %700 = vrot.lane.b32.xlu1 %v1710_v9, %s1583_s0 }
 0x2ec   : > { %584 = vrot.lane.b32.xlu0 %v1710_v9, %s1584_s24 }
 0x2f0   : > { %942 = vrot.lane.b32.xlu0 %v1710_v9, %s1585_s25 }
 0x303   : > { %937 = vadd.xlane.f32.xlu1 %v936_v14 }
 0x314   : > { %821 = vrot.lane.b32.xlu1 %v1710_v9, %s1586_s26 }
 0x34f   : > { %v580_v15 = vpop.xlane.xlu0 %579 }
 0x350   : > { %1538 = vrcp.f32 %v580_v15 }
 0x357   : > { %v696_v16 = vpop.xlane.xlu1 %695 }
 0x358   : > { %1540 = vrcp.f32 %v696_v16  ;;  %v1524_v16 = vld [vmem:[%s1848_s8 + $0x8] sm:$0xff]  }
 0x35b   : > { %v701_v22 = vpop.permute.xlu1 %700 }
 0x35c   : > { %v706_v25 = vsel %vm589_vm4, %v701_v22, 0 }
 0x35d   : > { %v1539_v17 = vpop.eup %1538 }
 0x35e   : > { %v582_v19 = vmul.f32 %v1539_v17, %v1531_v0  ;;  %v1357_v0 = vld [vmem:[%s1845_s5] ss:$0 sm:$0xff]  ;;  %v1526_v17 = vld [vmem:[%s1850_s10 + $0x18] sm:$0xff]  }
 0x35f   : > { %v817_v18 = vpop.xlane.xlu0 %816 }
 0x360   : > { %v583_v23 = vpack.c.bf16 %v582_v19, %v582_v19  ;;  %1542 = vrcp.f32 %v817_v18  ;;  %v1527_v18 = vld [vmem:[%s1850_s10 + $0x10] sm:$0xff]  }
 0x363   : > { %v585_v20 = vpop.permute.xlu0 %584 }
 0x364   : > { %v591_v21 = vsel %vm589_vm4, %v585_v20, 0 }
 0x365   : > { %1425 = vmatpush3.bf16.msra.mxu0 %v591_v21  ;;  %v1541_v24 = vpop.eup %1540 }
 0x366   : > { %1436 = vmatprep.subr.bf16.mxu0 %v1573_v1  ;;  %v698_v9 = vmul.f32 %v1541_v24, %v1533_v5 }
 0x367   : > { %v943_v32 = vpop.permute.xlu0 %942 }
 0x368   : > { %1427 = vmatmul.mubr.msk.bf16.vlgmr.msra.gmra.mxu0 %vm523_vm2, %v583_v23  ;;  %v699_v26 = vpack.c.bf16 %v698_v9, %v698_v9  ;;  %v948_v34 = vsel %vm589_vm4, %v943_v32, 0  ;;  %v1361_v23 = vld [vmem:[%s1846_s6] ss:$0 sm:$0xff] }
 0x369   : > { %1437 = vmatpush3.bf16.msra.mxu0 %v706_v25  ;;  %1438 = vmatprep.mubr.msk.bf16.mxu0 %vm1574_vm0, %v1573_v1  ;;  %v1362_v25 = vld [vmem:[%s1847_s7] ss:$0 sm:$0xff] }
 0x36a   : > { %1448 = vmatprep.subr.bf16.mxu0 %v1573_v1 }
 0x36d   : > { %v1543_v27 = vpop.eup %1542 }
 0x36e   : > { %v819_v29 = vmul.f32 %v1543_v27, %v1535_v7 }
 0x370   : > { %1439 = vmatmul.mubr.msk.bf16.vlgmr.msra.gmra.mxu0 %vm523_vm2, %v699_v26  ;;  %v820_v33 = vpack.c.bf16 %v819_v29, %v819_v29  ;;  %v1529_v29 = vld [vmem:[%s1850_s10] sm:$0xff]  }
 0x371   : > { %1450 = vmatprep.mubr.msk.bf16.mxu0 %vm1574_vm0, %v1573_v1 }
 0x38c   : > { %v938_v28 = vpop.xlane.xlu1 %937 }
 0x38d   : > { %1544 = vrcp.f32 %v938_v28  ;;  %v1528_v28 = vld [vmem:[%s1850_s10 + $0x8] sm:$0xff]  }
 0x390   : > { %v822_v30 = vpop.permute.xlu1 %821 }
 0x391   : > { %v827_v31 = vsel %vm589_vm4, %v822_v30, 0  ;;  %v1363_v30 = vld [vmem:[%s1849_s9] ss:$0 sm:$0xff] }
 0x392   : > { %1449 = vmatpush3.bf16.msra.mxu0 %v827_v31 }
 0x393   : > { %1460 = vmatprep.subr.bf16.mxu0 %v1573_v1 }
 0x395   : > { %1451 = vmatmul.mubr.msk.bf16.vlgmr.msra.gmra.mxu0 %vm523_vm2, %v820_v33 }
 0x396   : > { %1461 = vmatpush3.bf16.msra.mxu0 %v948_v34  ;;  %1462 = vmatprep.mubr.msk.bf16.mxu0 %vm1574_vm0, %v1573_v1 }
 0x397   : > { %1474 = vmatprep.subr.bf16.mxu0 %v1573_v1 }
 0x39a   : > { %v1545_v35 = vpop.eup %1544 }
 0x39b   : > { %v940_v36 = vmul.f32 %v1545_v35, %v1537_v13 }
 0x39d   : > { %v941_v37 = vpack.c.bf16 %v940_v36, %v940_v36 }
 0x39f   : > { %1463 = vmatmul.mubr.msk.bf16.vlgmr.msra.gmra.mxu0 %vm523_vm2, %v941_v37 }
 0x3a0   : > { %1478 = vmatprep.mubr.msk.bf16.mxu0 %vm1574_vm0, %v1573_v1  ;;  %1475 = vmatpush3.bf16.msra.mxu0 %v1524_v16 }
 0x3a1   : > { %1476 = vmatprep.subr.bf16.mxu0 %v1573_v1 }
 0x428   : > { %v627_v38 = vpop.f32.mrf.mxu0 }
 0x429   : > { %v633_v39 = vpack.c.bf16 %v627_v38, %v627_v38 }
 0x42a   : > { %v1428_v40 = vpop.f32.mrf.mxu0 }
 0x42b   : > { %635 = vst.msk [vmem:[#allocation2] sm:$0xf] %vm634_vm5, %v633_v39 }
 0x42c   : > { %v630_v41 = vpop.f32.mrf.mxu0 }
 0x42e   : > { %v1429_v42 = vpop.f32.mrf.mxu0 }
 0x430   : > { %v742_v43 = vpop.f32.mrf.mxu0 }
 0x431   : > { %v1377_v44 = vpack.c.bf16 %v742_v43, %v742_v43 }
 0x432   : > { %v1440_v45 = vpop.f32.mrf.mxu0 }
 0x433   : > { %752 = vrot.lane.b32.xlu1 %v1377_v44, %s1587_s27 }
 0x434   : > { %v745_v46 = vpop.f32.mrf.mxu0 }
 0x436   : > { %v1441_v47 = vpop.f32.mrf.mxu0 }
 0x455   : > { %v863_v49 = vpop.f32.mrf.mxu0 }
 0x456   : > { %v1378_v50 = vpack.c.bf16 %v863_v49, %v863_v49 }
 0x457   : > { %v1452_v52 = vpop.f32.mrf.mxu0 }
 0x458   : > { %873 = vrot.lane.b32.xlu0 %v1378_v50, %s1588_s16 }
 0x459   : > { %v866_v53 = vpop.f32.mrf.mxu0 }
 0x45b   : > { %v1453_v54 = vpop.f32.mrf.mxu0 }
 0x45c   : > { %v1373_v54 = vld [vmem:[%s1852_s12] ss:$0 sm:$0xff] }
 0x45f   : > { %v984_v55 = vpop.f32.mrf.mxu0 }
 0x460   : > { %v1379_v56 = vpack.c.bf16 %v984_v55, %v984_v55 }
 0x461   : > { %v1464_v57 = vpop.f32.mrf.mxu0 }
 0x462   : > { %994 = vrot.lane.b32.xlu1 %v1379_v56, %s1589_s17  ;;  %v1374_v56 = vld [vmem:[%s1853_s13] ss:$0 sm:$0xff]  ;;  %s442_s17 = scalar_lea.vmem %s1854_s14, %s1341_s30 }
 0x463   : > { %v987_v58 = vpop.f32.mrf.mxu0 }
 0x465   : > { %v1465_v59 = vpop.f32.mrf.mxu0 }
 0x4a5   : > { %v753_v60 = vpop.permute.xlu1 %752 }
 0x4a6   : > { %756 = vst.msk [vmem:[#allocation2] sm:$0xf] %vm755_vm6, %v753_v60 }
 0x4ca   : > { %v874_v61 = vpop.permute.xlu0 %873 }
 0x4cb   : > { %877 = vst.msk [vmem:[#allocation2] sm:$0xf] %vm876_vm7, %v874_v61 }
 0x4d4   : > { %v995_v62 = vpop.permute.xlu1 %994 }
 0x4d5   : > { %998 = vst.msk [vmem:[#allocation2] sm:$0xf] %vm997_vm8, %v995_v62 }
 0x4dc   : > { %v999_v63 = vld [vmem:[#allocation2] sm:$0xf] }
 0x4dd   : > { %1471 = vmatmul.mubr.msk.bf16.vlgmr.msra.gmra.mxu1 %vm470_vm1, %v999_v63 }
 0x4de   : > { %1490 = vmatprep.mubr.msk.bf16.mxu1 %vm1574_vm0, %v1573_v1  ;;  %1483 = vmatpush3.bf16.msra.mxu1 %v1526_v17 }
 0x4df   : > { %1484 = vmatprep.subr.bf16.mxu1 %v1573_v1 }
 0x4e2   : > { %1485 = vmatpush3.bf16.msra.mxu1 %v1527_v18 }
 0x4e3   : > { %1486 = vmatprep.subr.bf16.mxu1 %v1573_v1 }
 0x4e6   : > { %1487 = vmatpush3.bf16.msra.mxu1 %v1528_v28 }
 0x4e7   : > { %1488 = vmatprep.subr.bf16.mxu1 %v1573_v1  ;;  %v1367_v1 = vld [vmem:[%s1851_s11] ss:$0 sm:$0xff] }
 0x4ea   : > { %1489 = vmatpush3.bf16.msra.mxu1 %v1529_v29 }
 0x59d   : > { %v1060_v2 = vpop.f32.mrf.mxu1 }
 0x59e   : > { %v1061_v4 = vadd.f32 %v1357_v0, %v1060_v2 }
 0x59f   : > { %v1472_v5 = vpop.f32.mrf.mxu1 }
 0x5a0   : > { %v1066_v6 = vadd.f32 %v1061_v4, %v1700_v3  ;;  %v1525_v3 = vld [vmem:[%s1848_s8] sm:$0xff]  }
 0x5a1   : > { %v1063_v7 = vpop.f32.mrf.mxu1  ;;  %1477 = vmatpush3.bf16.msra.mxu0 %v1525_v3 }
 0x5a2   : > { %v1069_v8 = vsel %vm470_vm1, %v1066_v6, 0.0 }
 0x5a3   : > { %1070 = vadd.xlane.f32.xlu0 %v1069_v8  ;;  %v1473_v10 = vpop.f32.mrf.mxu1 }
 0x62c   : > { %v1071_v11 = vpop.xlane.xlu0 %1070 }
 0x62d   : > { %v1073_v12 = vmul.f32 0.03125, %v1071_v11 }
 0x62f   : > { %v1074_v13 = vsub.f32 %v1066_v6, %v1073_v12 }
 0x631   : > { %v1075_v14 = vmul.f32 %v1074_v13, %v1074_v13 }
 0x633   : > { %v1076_v15 = vsel %vm470_vm1, %v1075_v14, 0.0 }
 0x634   : > { %1077 = vadd.xlane.f32.xlu1 %v1076_v15 }
 0x6bd   : > { %v1078_v19 = vpop.xlane.xlu1 %1077 }
 0x6be   : > { %v1079_v20 = vmul.f32 0.03125, %v1078_v19 }
 0x6c0   : > { %v1080_v21 = vadd.f32 1e-05, %v1079_v20 }
 0x6c2   : > { %1546 = vrsqrt.f32 %v1080_v21 }
 0x6cf   : > { %v1547_v22 = vpop.eup %1546 }
 0x6d0   : > { %v1082_v24 = vmul.f32 %v1547_v22, %v1074_v13 }
 0x6d2   : > { %v1089_v9 = vmul.f32 %v1361_v23, %v1082_v24 }
 0x6d4   : > { %v1096_v26 = vadd.f32 %v1362_v25, %v1089_v9 }
 0x6d6   : > { %v1097_v27 = vpack.c.bf16 %v1096_v26, %v1096_v26 }
 0x6d8   : > { %1479 = vmatmul.mubr.msk.bf16.vlgmr.msra.gmra.mxu0 %vm470_vm1, %v1097_v27 }
 0x798   : > { %v1158_v31 = vpop.f32.mrf.mxu0 }
 0x799   : > { %v1159_v32 = vadd.f32 %v1363_v30, %v1158_v31 }
 0x79a   : > { %v1480_v33 = vpop.f32.mrf.mxu0 }
 0x79b   : > { %v1164_v34 = vmax.f32 %v1159_v32, 0.0 }
 0x79c   : > { %v1161_v35 = vpop.f32.mrf.mxu0 }
 0x79d   : > { %v1165_v36 = vpack.c.bf16 %v1164_v34, %v1164_v34 }
 0x79e   : > { %v1481_v37 = vpop.f32.mrf.mxu0 }
 0x79f   : > { %1491 = vmatmul.mubr.msk.bf16.vlgmr.msra.gmra.mxu1 %vm1205_vm9, %v1165_v36 }
 0x85f   : > { %v1243_v38 = vpop.f32.mrf.mxu1 }
 0x860   : > { %v1244_v39 = vadd.f32 %v1367_v1, %v1243_v38 }
 0x861   : > { %v1492_v40 = vpop.f32.mrf.mxu1 }
 0x862   : > { %v1249_v41 = vadd.f32 %v1244_v39, %v1096_v26 }
 0x863   : > { %v1246_v42 = vpop.f32.mrf.mxu1 }
 0x864   : > { %v1252_v43 = vsel %vm470_vm1, %v1249_v41, 0.0 }
 0x865   : > { %1253 = vadd.xlane.f32.xlu0 %v1252_v43  ;;  %v1493_v44 = vpop.f32.mrf.mxu1 }
 0x8ee   : > { %v1254_v45 = vpop.xlane.xlu0 %1253 }
 0x8ef   : > { %v1255_v46 = vmul.f32 0.03125, %v1254_v45 }
 0x8f1   : > { %v1256_v47 = vsub.f32 %v1249_v41, %v1255_v46 }
 0x8f3   : > { %v1257_v48 = vmul.f32 %v1256_v47, %v1256_v47 }
 0x8f5   : > { %v1258_v49 = vsel %vm470_vm1, %v1257_v48, 0.0 }
 0x8f6   : > { %1259 = vadd.xlane.f32.xlu0 %v1258_v49 }
 0x97f   : > { %v1260_v50 = vpop.xlane.xlu0 %1259 }
 0x980   : > { %v1261_v51 = vmul.f32 0.03125, %v1260_v50 }
 0x982   : > { %v1262_v52 = vadd.f32 1e-05, %v1261_v51 }
 0x984   : > { %1548 = vrsqrt.f32 %v1262_v52 }
 0x991   : > { %v1549_v53 = vpop.eup %1548 }
 0x992   : > { %v1264_v55 = vmul.f32 %v1549_v53, %v1256_v47 }
 0x994   : > { %v1271_v57 = vmul.f32 %v1373_v54, %v1264_v55 }
 0x996   : > { %v1278_v58 = vadd.f32 %v1374_v56, %v1271_v57 }
 0x998   : > { %v1279_v59 = vpack.c.bf16 %v1278_v58, %v1278_v58 }
 0x99a   : > { %1281 = vst.msk [vmem:[%s442_s17] sm:$0xf] %vm1280_vm10, %v1279_v59 }
 0x99b PF: > { %s30_s18 = sadd.s32 1, %s1570_s18  }
 0x99c   : > { %p27_p9 = scmp.ge.s32.totalorder %s30_s18, 4  }
 0x99e   :  { %29 = sbr.rel (!%p27_p9) target bundleno = 16 (0x10), region = 102 }

</bundles_post_ra>
